<compile_context>
chip_gen: v5e
topology: v5e:2x2
jax: 0.10.0
libtpu: 0.0.40
codegen_flags: <defaults>
</compile_context>

<pallas_src>
import functools

import jax
import jax.numpy as jnp
from jax.experimental import pallas as pl
from jax.experimental.pallas import tpu as pltpu


def _layernorm(v, w, b, eps=1e-5):
    mu = jnp.mean(v, axis=-1, keepdims=True)
    var = jnp.mean((v - mu) ** 2, axis=-1, keepdims=True)
    return (v - mu) * jax.lax.rsqrt(var + eps) * w + b


def _gelu_exact(v):
    # nn.GELU default = exact (erf) GELU
    return 0.5 * v * (1.0 + jax.lax.erf(v * (2.0 ** -0.5)))


def cross_encoder_kernel(
    x_ref, c_ref,
    ln_x1_w, ln_x1_b, ln_c1_w, ln_c1_b,
    wq_ref, wk_ref, wv_ref, wproj_ref, bproj_ref,
    ln_x2_w, ln_x2_b,
    w1_ref, b1_ref, w2_ref, b2_ref,
    o_ref, *, num_heads, scale):
    f32 = jnp.float32
    bf16 = jnp.bfloat16

    Bt, Nx, C = x_ref.shape
    _, Nc, _ = c_ref.shape
    Nk = Nx + Nc
    Dh = C // num_heads

    x = x_ref[...].astype(f32).reshape(Bt * Nx, C)
    c = c_ref[...].astype(f32).reshape(Bt * Nc, C)

    # --- pre-norms (f32) ---
    xn = _layernorm(x, ln_x1_w[...], ln_x1_b[...])          # (Bt*Nx, C)
    cn = _layernorm(c, ln_c1_w[...], ln_c1_b[...])          # (Bt*Nc, C)

    xn_b = xn.astype(bf16)
    comp_b = jnp.concatenate(
        [xn_b.reshape(Bt, Nx, C), cn.astype(bf16).reshape(Bt, Nc, C)],
        axis=1).reshape(Bt * Nk, C)                          # (Bt*Nk, C) bf16

    # --- cross attention ---
    # residual inside attention goes through the projection:
    #   (concat_h(o_h) + xn) @ Wproj = sum_h o_h @ Wproj[hDh:(h+1)Dh] + xn @ Wproj
    proj_acc = jnp.dot(xn_b, wproj_ref[...], preferred_element_type=f32)

    for h in range(num_heads):                               # static loop, no lane slices
        qh = (jnp.dot(xn_b, wq_ref[h], preferred_element_type=f32)
              * scale).astype(bf16).reshape(Bt, Nx, Dh)
        kh = jnp.dot(comp_b, wk_ref[h],
                     preferred_element_type=f32).astype(bf16).reshape(Bt, Nk, Dh)
        vh = jnp.dot(comp_b, wv_ref[h],
                     preferred_element_type=f32).astype(bf16).reshape(Bt, Nk, Dh)

        s = jnp.einsum('bqd,bkd->bqk', qh, kh, preferred_element_type=f32)
        s = s - jnp.max(s, axis=-1, keepdims=True)
        p = jnp.exp(s)
        p = p * pl.reciprocal(jnp.sum(p, axis=-1, keepdims=True), approx=True)

        oh = jnp.einsum('bqk,bkd->bqd', p.astype(bf16), vh,
                        preferred_element_type=f32).reshape(Bt * Nx, Dh)
        proj_acc = proj_acc + jnp.dot(
            oh.astype(bf16), wproj_ref[h * Dh:(h + 1) * Dh, :],
            preferred_element_type=f32)

    attn = proj_acc + bproj_ref[...]
    x1 = xn + attn                                           # outer residual (on normed x)

    # --- MLP ---
    x2n = _layernorm(x1, ln_x2_w[...], ln_x2_b[...])
    hid = _gelu_exact(
        jnp.dot(x2n.astype(bf16), w1_ref[...], preferred_element_type=f32)
        + b1_ref[...])
    mlp = jnp.dot(hid.astype(bf16), w2_ref[...],
                  preferred_element_type=f32) + b2_ref[...]

    o_ref[...] = (x1 + mlp).reshape(Bt, Nx, C).astype(o_ref.dtype)


def cross_transformer_encoder_layer(x, complement, params, num_heads):
    B, Nx, C = x.shape
    _, Nc, _ = complement.shape
    Dh = C // num_heads
    scale = Dh ** (-0.5)
    bf16 = jnp.bfloat16

    # Split the fused kv weight and pre-stack q/k/v weights per head:
    #   (C, C) -> (H, C, Dh). Weights are cast to bf16 once (halves DMA too).
    wkv = params['wkv']
    wk_full, wv_full = wkv[:, :C], wkv[:, C:]

    def per_head(w):
        return jnp.transpose(w.reshape(C, num_heads, Dh), (1, 0, 2))

    weights = [
        params['ln_x1_w'], params['ln_x1_b'],
        params['ln_c1_w'], params['ln_c1_b'],
        per_head(params['wq']).astype(bf16),
        per_head(wk_full).astype(bf16),
        per_head(wv_full).astype(bf16),
        params['wproj'].astype(bf16), params['bproj'],
        params['ln_x2_w'], params['ln_x2_b'],
        params['w1'].astype(bf16), params['b1'],
        params['w2'].astype(bf16), params['b2'],
    ]

    # Multiple batch elements per grid step so the dense GEMMs see a taller M.
    bt = 1
    for cand in range(1, B + 1):
        if B % cand == 0 and cand * Nx <= 512:
            bt = cand

    def full_spec(a):
        nd = a.ndim
        return pl.BlockSpec(a.shape, lambda b, _nd=nd: (0,) * _nd)

    in_specs = (
        [pl.BlockSpec((bt, Nx, C), lambda b: (b, 0, 0)),
         pl.BlockSpec((bt, Nc, C), lambda b: (b, 0, 0))]
        + [full_spec(w) for w in weights]
    )
    out_spec = pl.BlockSpec((bt, Nx, C), lambda b: (b, 0, 0))

    kernel = functools.partial(cross_encoder_kernel,
                               num_heads=num_heads, scale=scale)
    return pl.pallas_call(
        kernel,
        out_shape=jax.ShapeDtypeStruct((B, Nx, C), x.dtype),
        grid_spec=pltpu.PrefetchScalarGridSpec(
            num_scalar_prefetch=0,
            grid=(B // bt,),
            in_specs=in_specs,
            out_specs=out_spec),
        compiler_params=pltpu.CompilerParams(
            dimension_semantics=("parallel",),
            vmem_limit_bytes=48 * 1024 * 1024),
    )(x, complement, *weights)


# -------------------- pure-JAX f32 reference (for validation) --------------------
def reference_forward(x, complement, params, num_heads):
    def ln(v, w, b):
        mu = jnp.mean(v, -1, keepdims=True)
        var = jnp.mean((v - mu) ** 2, -1, keepdims=True)
        return (v - mu) * jax.lax.rsqrt(var + 1e-5) * w + b

    B, Nx, C = x.shape
    Dh = C // num_heads
    scale = Dh ** (-0.5)

    xn = ln(x, params['ln_x1_w'][0], params['ln_x1_b'][0])
    cn = ln(complement, params['ln_c1_w'][0], params['ln_c1_b'][0])
    comp = jnp.concatenate([xn, cn], axis=1)
    Nk = comp.shape[1]

    q = xn @ params['wq']
    kv = comp @ params['wkv']
    k, v = kv[..., :C], kv[..., C:]
    qh = q.reshape(B, Nx, num_heads, Dh).transpose(0, 2, 1, 3)
    kh = k.reshape(B, Nk, num_heads, Dh).transpose(0, 2, 1, 3)
    vh = v.reshape(B, Nk, num_heads, Dh).transpose(0, 2, 1, 3)
    s = jnp.einsum('bhqd,bhkd->bhqk', qh, kh) * scale
    p = jax.nn.softmax(s, axis=-1)
    o = jnp.einsum('bhqk,bhkd->bhqd', p, vh).transpose(0, 2, 1, 3).reshape(B, Nx, C)
    o = o + xn
    o = o @ params['wproj'] + params['bproj'][0]
    x1 = xn + o

    x2n = ln(x1, params['ln_x2_w'][0], params['ln_x2_b'][0])
    h = x2n @ params['w1'] + params['b1'][0]
    h = 0.5 * h * (1.0 + jax.lax.erf(h * (2.0 ** -0.5)))
    m = h @ params['w2'] + params['b2'][0]
    return x1 + m


if __name__ == "__main__":
    B, Nx, Nc, C, NUM_HEADS = 2, 8, 8, 32, 4
    MLP_HIDDEN = int(C * 1.0)   # mlp_ratio = 1.0

    key = jax.random.PRNGKey(0)
    ks = jax.random.split(key, 8)
    x = jax.random.normal(ks[0], (B, Nx, C), jnp.float32)
    complement = jax.random.normal(ks[1], (B, Nc, C), jnp.float32)

    def wmat(k, shape):
        return jax.random.normal(k, shape, jnp.float32) * 0.02

    params = {
        # LayerNorms (PyTorch default init: weight=1, bias=0), stored as (1, C)
        'ln_x1_w': jnp.ones((1, C), jnp.float32),
        'ln_x1_b': jnp.zeros((1, C), jnp.float32),
        'ln_c1_w': jnp.ones((1, C), jnp.float32),
        'ln_c1_b': jnp.zeros((1, C), jnp.float32),
        'ln_x2_w': jnp.ones((1, C), jnp.float32),
        'ln_x2_b': jnp.zeros((1, C), jnp.float32),
        # attention projections (stored as (in, out), i.e. PyTorch W^T)
        'wq': wmat(ks[2], (C, C)),
        'wkv': wmat(ks[3], (C, 2 * C)),
        'wproj': wmat(ks[4], (C, C)),
        'bproj': jnp.zeros((1, C), jnp.float32),
        # MLP
        'w1': wmat(ks[5], (C, MLP_HIDDEN)),
        'b1': jnp.zeros((1, MLP_HIDDEN), jnp.float32),
        'w2': wmat(ks[6], (MLP_HIDDEN, C)),
        'b2': jnp.zeros((1, C), jnp.float32),
    }

    out = cross_transformer_encoder_layer(x, complement, params, NUM_HEADS)
    out = jax.block_until_ready(out)

    ref = reference_forward(x, complement, params, NUM_HEADS)
    assert out.shape == (B, Nx, C)
    assert bool(jnp.isfinite(out).all())
    # bf16 GEMM operands + approx reciprocal -> slightly looser tolerance vs f32 ref
    assert bool(jnp.allclose(out, ref, rtol=2e-2, atol=2e-2)), (
        f"max abs err = {float(jnp.max(jnp.abs(out - ref)))}")

    print("KERNEL_OK")
</pallas_src>

<mosaic_0001>
module attributes {stable_mosaic.version = 11 : i64} {
  func.func @cross_encoder_kernel(%arg0: i32, %arg1: memref<2x8x32xf32, #tpu.memory_space<vmem>>, %arg2: memref<2x8x32xf32, #tpu.memory_space<vmem>>, %arg3: memref<1x32xf32, #tpu.memory_space<vmem>>, %arg4: memref<1x32xf32, #tpu.memory_space<vmem>>, %arg5: memref<1x32xf32, #tpu.memory_space<vmem>>, %arg6: memref<1x32xf32, #tpu.memory_space<vmem>>, %arg7: memref<4x32x8xbf16, #tpu.memory_space<vmem>>, %arg8: memref<4x32x8xbf16, #tpu.memory_space<vmem>>, %arg9: memref<4x32x8xbf16, #tpu.memory_space<vmem>>, %arg10: memref<32x32xbf16, #tpu.memory_space<vmem>>, %arg11: memref<1x32xf32, #tpu.memory_space<vmem>>, %arg12: memref<1x32xf32, #tpu.memory_space<vmem>>, %arg13: memref<1x32xf32, #tpu.memory_space<vmem>>, %arg14: memref<32x32xbf16, #tpu.memory_space<vmem>>, %arg15: memref<1x32xf32, #tpu.memory_space<vmem>>, %arg16: memref<32x32xbf16, #tpu.memory_space<vmem>>, %arg17: memref<1x32xf32, #tpu.memory_space<vmem>>, %arg18: memref<2x8x32xf32, #tpu.memory_space<vmem>>) attributes {dimension_semantics = [#tpu.dimension_semantics<parallel>], iteration_bounds = array<i64: 1>, scalar_prefetch = 0 : i64, scratch_operands = 0 : i64, tpu.core_type = #tpu.core_type<tc>, window_params = [{transform_indices = @transform_0, window_bounds = array<i64: 2, 8, 32>}, {transform_indices = @transform_1, window_bounds = array<i64: 2, 8, 32>}, {pipeline_mode = #tpu.pipeline_mode<synchronous>, transform_indices = @transform_2, window_bounds = array<i64: 1, 32>}, {pipeline_mode = #tpu.pipeline_mode<synchronous>, transform_indices = @transform_3, window_bounds = array<i64: 1, 32>}, {pipeline_mode = #tpu.pipeline_mode<synchronous>, transform_indices = @transform_4, window_bounds = array<i64: 1, 32>}, {pipeline_mode = #tpu.pipeline_mode<synchronous>, transform_indices = @transform_5, window_bounds = array<i64: 1, 32>}, {pipeline_mode = #tpu.pipeline_mode<synchronous>, transform_indices = @transform_6, window_bounds = array<i64: 4, 32, 8>}, {pipeline_mode = #tpu.pipeline_mode<synchronous>, transform_indices = @transform_7, window_bounds = array<i64: 4, 32, 8>}, {pipeline_mode = #tpu.pipeline_mode<synchronous>, transform_indices = @transform_8, window_bounds = array<i64: 4, 32, 8>}, {pipeline_mode = #tpu.pipeline_mode<synchronous>, transform_indices = @transform_9, window_bounds = array<i64: 32, 32>}, {pipeline_mode = #tpu.pipeline_mode<synchronous>, transform_indices = @transform_10, window_bounds = array<i64: 1, 32>}, {pipeline_mode = #tpu.pipeline_mode<synchronous>, transform_indices = @transform_11, window_bounds = array<i64: 1, 32>}, {pipeline_mode = #tpu.pipeline_mode<synchronous>, transform_indices = @transform_12, window_bounds = array<i64: 1, 32>}, {pipeline_mode = #tpu.pipeline_mode<synchronous>, transform_indices = @transform_13, window_bounds = array<i64: 32, 32>}, {pipeline_mode = #tpu.pipeline_mode<synchronous>, transform_indices = @transform_14, window_bounds = array<i64: 1, 32>}, {pipeline_mode = #tpu.pipeline_mode<synchronous>, transform_indices = @transform_15, window_bounds = array<i64: 32, 32>}, {pipeline_mode = #tpu.pipeline_mode<synchronous>, transform_indices = @transform_16, window_bounds = array<i64: 1, 32>}, {transform_indices = @transform_17, window_bounds = array<i64: 2, 8, 32>}]} {
    %c0 = arith.constant 0 : index
    %c0_0 = arith.constant 0 : index
    %c0_1 = arith.constant 0 : index
    %0 = vector.load %arg1[%c0, %c0_0, %c0_1] : memref<2x8x32xf32, #tpu.memory_space<vmem>>, vector<2x8x32xf32>
    %1 = vector.shape_cast %0 : vector<2x8x32xf32> to vector<16x32xf32>
    %c0_2 = arith.constant 0 : index
    %c0_3 = arith.constant 0 : index
    %c0_4 = arith.constant 0 : index
    %2 = vector.load %arg2[%c0_2, %c0_3, %c0_4] : memref<2x8x32xf32, #tpu.memory_space<vmem>>, vector<2x8x32xf32>
    %3 = vector.shape_cast %2 : vector<2x8x32xf32> to vector<16x32xf32>
    %c0_5 = arith.constant 0 : index
    %c0_6 = arith.constant 0 : index
    %4 = vector.load %arg3[%c0_5, %c0_6] : memref<1x32xf32, #tpu.memory_space<vmem>>, vector<1x32xf32>
    %c0_7 = arith.constant 0 : index
    %c0_8 = arith.constant 0 : index
    %5 = vector.load %arg4[%c0_7, %c0_8] : memref<1x32xf32, #tpu.memory_space<vmem>>, vector<1x32xf32>
    %cst = arith.constant dense<0.000000e+00> : vector<16xf32>
    %6 = vector.multi_reduction <add>, %1, %cst [1] : vector<16x32xf32> to vector<16xf32>
    %7 = vector.shape_cast %6 : vector<16xf32> to vector<16x1xf32>
    %cst_9 = arith.constant 3.200000e+01 : f32
    %8 = vector.broadcast %cst_9 : f32 to vector<16x1xf32>
    %9 = arith.divf %7, %8 : vector<16x1xf32>
    %10 = vector.broadcast %9 : vector<16x1xf32> to vector<16x32xf32>
    %11 = arith.subf %1, %10 : vector<16x32xf32>
    %12 = arith.mulf %11, %11 : vector<16x32xf32>
    %cst_10 = arith.constant dense<0.000000e+00> : vector<16xf32>
    %13 = vector.multi_reduction <add>, %12, %cst_10 [1] : vector<16x32xf32> to vector<16xf32>
    %14 = vector.shape_cast %13 : vector<16xf32> to vector<16x1xf32>
    %cst_11 = arith.constant 3.200000e+01 : f32
    %15 = vector.broadcast %cst_11 : f32 to vector<16x1xf32>
    %16 = arith.divf %14, %15 : vector<16x1xf32>
    %17 = vector.broadcast %9 : vector<16x1xf32> to vector<16x32xf32>
    %18 = arith.subf %1, %17 : vector<16x32xf32>
    %cst_12 = arith.constant 9.99999974E-6 : f32
    %19 = vector.broadcast %cst_12 : f32 to vector<16x1xf32>
    %20 = arith.addf %16, %19 : vector<16x1xf32>
    %21 = math.rsqrt %20 : vector<16x1xf32>
    %22 = vector.broadcast %21 : vector<16x1xf32> to vector<16x32xf32>
    %23 = arith.mulf %18, %22 : vector<16x32xf32>
    %24 = vector.broadcast %4 : vector<1x32xf32> to vector<16x32xf32>
    %25 = arith.mulf %23, %24 : vector<16x32xf32>
    %26 = vector.broadcast %5 : vector<1x32xf32> to vector<16x32xf32>
    %27 = arith.addf %25, %26 : vector<16x32xf32>
    %c0_13 = arith.constant 0 : index
    %c0_14 = arith.constant 0 : index
    %28 = vector.load %arg5[%c0_13, %c0_14] : memref<1x32xf32, #tpu.memory_space<vmem>>, vector<1x32xf32>
    %c0_15 = arith.constant 0 : index
    %c0_16 = arith.constant 0 : index
    %29 = vector.load %arg6[%c0_15, %c0_16] : memref<1x32xf32, #tpu.memory_space<vmem>>, vector<1x32xf32>
    %cst_17 = arith.constant dense<0.000000e+00> : vector<16xf32>
    %30 = vector.multi_reduction <add>, %3, %cst_17 [1] : vector<16x32xf32> to vector<16xf32>
    %31 = vector.shape_cast %30 : vector<16xf32> to vector<16x1xf32>
    %cst_18 = arith.constant 3.200000e+01 : f32
    %32 = vector.broadcast %cst_18 : f32 to vector<16x1xf32>
    %33 = arith.divf %31, %32 : vector<16x1xf32>
    %34 = vector.broadcast %33 : vector<16x1xf32> to vector<16x32xf32>
    %35 = arith.subf %3, %34 : vector<16x32xf32>
    %36 = arith.mulf %35, %35 : vector<16x32xf32>
    %cst_19 = arith.constant dense<0.000000e+00> : vector<16xf32>
    %37 = vector.multi_reduction <add>, %36, %cst_19 [1] : vector<16x32xf32> to vector<16xf32>
    %38 = vector.shape_cast %37 : vector<16xf32> to vector<16x1xf32>
    %cst_20 = arith.constant 3.200000e+01 : f32
    %39 = vector.broadcast %cst_20 : f32 to vector<16x1xf32>
    %40 = arith.divf %38, %39 : vector<16x1xf32>
    %41 = vector.broadcast %33 : vector<16x1xf32> to vector<16x32xf32>
    %42 = arith.subf %3, %41 : vector<16x32xf32>
    %cst_21 = arith.constant 9.99999974E-6 : f32
    %43 = vector.broadcast %cst_21 : f32 to vector<16x1xf32>
    %44 = arith.addf %40, %43 : vector<16x1xf32>
    %45 = math.rsqrt %44 : vector<16x1xf32>
    %46 = vector.broadcast %45 : vector<16x1xf32> to vector<16x32xf32>
    %47 = arith.mulf %42, %46 : vector<16x32xf32>
    %48 = vector.broadcast %28 : vector<1x32xf32> to vector<16x32xf32>
    %49 = arith.mulf %47, %48 : vector<16x32xf32>
    %50 = vector.broadcast %29 : vector<1x32xf32> to vector<16x32xf32>
    %51 = arith.addf %49, %50 : vector<16x32xf32>
    %52 = arith.truncf %27 : vector<16x32xf32> to vector<16x32xbf16>
    %53 = vector.shape_cast %52 : vector<16x32xbf16> to vector<2x8x32xbf16>
    %54 = arith.truncf %51 : vector<16x32xf32> to vector<16x32xbf16>
    %55 = vector.shape_cast %54 : vector<16x32xbf16> to vector<2x8x32xbf16>
    %56 = tpu.concatenate %53, %55 in 1 : vector<2x8x32xbf16>, vector<2x8x32xbf16> -> vector<2x16x32xbf16>
    %57 = vector.shape_cast %56 : vector<2x16x32xbf16> to vector<32x32xbf16>
    %c0_22 = arith.constant 0 : index
    %c0_23 = arith.constant 0 : index
    %58 = vector.load %arg10[%c0_22, %c0_23] : memref<32x32xbf16, #tpu.memory_space<vmem>>, vector<32x32xbf16>
    %cst_24 = arith.constant dense<0.000000e+00> : vector<16x32xf32>
    %59 = tpu.matmul %52, %58, %cst_24 {dimension_numbers = #tpu.dot_dimension_numbers<[1], [0], [0], [1], [0, 0, 1, 1], [], []>} : vector<16x32xbf16>, vector<32x32xbf16>, vector<16x32xf32> -> vector<16x32xf32>
    %c0_25 = arith.constant 0 : index
    %c0_26 = arith.constant 0 : index
    %c0_27 = arith.constant 0 : index
    %60 = vector.load %arg7[%c0_25, %c0_26, %c0_27] : memref<4x32x8xbf16, #tpu.memory_space<vmem>>, vector<1x32x8xbf16>
    %61 = vector.shape_cast %60 : vector<1x32x8xbf16> to vector<32x8xbf16>
    %cst_28 = arith.constant dense<0.000000e+00> : vector<16x8xf32>
    %62 = tpu.matmul %52, %61, %cst_28 {dimension_numbers = #tpu.dot_dimension_numbers<[1], [0], [0], [1], [0, 0, 1, 1], [], []>} : vector<16x32xbf16>, vector<32x8xbf16>, vector<16x8xf32> -> vector<16x8xf32>
    %cst_29 = arith.constant 0.353553385 : f32
    %63 = vector.broadcast %cst_29 : f32 to vector<16x8xf32>
    %64 = arith.mulf %62, %63 : vector<16x8xf32>
    %65 = arith.truncf %64 : vector<16x8xf32> to vector<16x8xbf16>
    %66 = vector.shape_cast %65 : vector<16x8xbf16> to vector<2x8x8xbf16>
    %c0_30 = arith.constant 0 : index
    %c0_31 = arith.constant 0 : index
    %c0_32 = arith.constant 0 : index
    %67 = vector.load %arg8[%c0_30, %c0_31, %c0_32] : memref<4x32x8xbf16, #tpu.memory_space<vmem>>, vector<1x32x8xbf16>
    %68 = vector.shape_cast %67 : vector<1x32x8xbf16> to vector<32x8xbf16>
    %cst_33 = arith.constant dense<0.000000e+00> : vector<32x8xf32>
    %69 = tpu.matmul %57, %68, %cst_33 {dimension_numbers = #tpu.dot_dimension_numbers<[1], [0], [0], [1], [0, 0, 1, 1], [], []>} : vector<32x32xbf16>, vector<32x8xbf16>, vector<32x8xf32> -> vector<32x8xf32>
    %70 = arith.truncf %69 : vector<32x8xf32> to vector<32x8xbf16>
    %71 = vector.shape_cast %70 : vector<32x8xbf16> to vector<2x16x8xbf16>
    %c0_34 = arith.constant 0 : index
    %c0_35 = arith.constant 0 : index
    %c0_36 = arith.constant 0 : index
    %72 = vector.load %arg9[%c0_34, %c0_35, %c0_36] : memref<4x32x8xbf16, #tpu.memory_space<vmem>>, vector<1x32x8xbf16>
    %73 = vector.shape_cast %72 : vector<1x32x8xbf16> to vector<32x8xbf16>
    %cst_37 = arith.constant dense<0.000000e+00> : vector<32x8xf32>
    %74 = tpu.matmul %57, %73, %cst_37 {dimension_numbers = #tpu.dot_dimension_numbers<[1], [0], [0], [1], [0, 0, 1, 1], [], []>} : vector<32x32xbf16>, vector<32x8xbf16>, vector<32x8xf32> -> vector<32x8xf32>
    %75 = arith.truncf %74 : vector<32x8xf32> to vector<32x8xbf16>
    %76 = vector.shape_cast %75 : vector<32x8xbf16> to vector<2x16x8xbf16>
    "tpu.trace_start"() <{level = 10 : i32, message = "bqd,bkd->bqk"}> : () -> ()
    %cst_38 = arith.constant dense<0.000000e+00> : vector<2x8x16xf32>
    %77 = tpu.matmul %66, %71, %cst_38 {dimension_numbers = #tpu.dot_dimension_numbers<[2], [2], [1], [1], [0, 0, 0, 1, 1, 1], [0], [0]>} : vector<2x8x8xbf16>, vector<2x16x8xbf16>, vector<2x8x16xf32> -> vector<2x8x16xf32>
    "tpu.trace_stop"() : () -> ()
    %cst_39 = arith.constant dense<0xFF800000> : vector<2x8xf32>
    %78 = vector.multi_reduction <maximumf>, %77, %cst_39 [2] : vector<2x8x16xf32> to vector<2x8xf32>
    %79 = vector.shape_cast %78 : vector<2x8xf32> to vector<2x8x1xf32>
    %80 = vector.broadcast %79 : vector<2x8x1xf32> to vector<2x8x16xf32>
    %81 = arith.subf %77, %80 : vector<2x8x16xf32>
    %82 = math.exp %81 : vector<2x8x16xf32>
    %cst_40 = arith.constant dense<0.000000e+00> : vector<2x8xf32>
    %83 = vector.multi_reduction <add>, %82, %cst_40 [2] : vector<2x8x16xf32> to vector<2x8xf32>
    %84 = vector.shape_cast %83 : vector<2x8xf32> to vector<2x8x1xf32>
    %85 = tpu.reciprocal %84 {approx = true} : vector<2x8x1xf32> -> vector<2x8x1xf32>
    %86 = vector.broadcast %85 : vector<2x8x1xf32> to vector<2x8x16xf32>
    %87 = arith.mulf %82, %86 : vector<2x8x16xf32>
    %88 = arith.truncf %87 : vector<2x8x16xf32> to vector<2x8x16xbf16>
    "tpu.trace_start"() <{level = 10 : i32, message = "bqk,bkd->bqd"}> : () -> ()
    %cst_41 = arith.constant dense<0.000000e+00> : vector<2x8x8xf32>
    %89 = tpu.matmul %88, %76, %cst_41 {dimension_numbers = #tpu.dot_dimension_numbers<[2], [1], [1], [2], [0, 0, 0, 1, 1, 2], [0], [0]>} : vector<2x8x16xbf16>, vector<2x16x8xbf16>, vector<2x8x8xf32> -> vector<2x8x8xf32>
    "tpu.trace_stop"() : () -> ()
    %90 = vector.shape_cast %89 : vector<2x8x8xf32> to vector<16x8xf32>
    %91 = arith.truncf %90 : vector<16x8xf32> to vector<16x8xbf16>
    %c0_42 = arith.constant 0 : index
    %c0_43 = arith.constant 0 : index
    %92 = vector.load %arg10[%c0_42, %c0_43] : memref<32x32xbf16, #tpu.memory_space<vmem>>, vector<8x32xbf16>
    %cst_44 = arith.constant dense<0.000000e+00> : vector<16x32xf32>
    %93 = tpu.matmul %91, %92, %cst_44 {dimension_numbers = #tpu.dot_dimension_numbers<[1], [0], [0], [1], [0, 0, 1, 1], [], []>} : vector<16x8xbf16>, vector<8x32xbf16>, vector<16x32xf32> -> vector<16x32xf32>
    %94 = arith.addf %59, %93 : vector<16x32xf32>
    %c1 = arith.constant 1 : index
    %c0_45 = arith.constant 0 : index
    %c0_46 = arith.constant 0 : index
    %95 = vector.load %arg7[%c1, %c0_45, %c0_46] : memref<4x32x8xbf16, #tpu.memory_space<vmem>>, vector<1x32x8xbf16>
    %96 = vector.shape_cast %95 : vector<1x32x8xbf16> to vector<32x8xbf16>
    %cst_47 = arith.constant dense<0.000000e+00> : vector<16x8xf32>
    %97 = tpu.matmul %52, %96, %cst_47 {dimension_numbers = #tpu.dot_dimension_numbers<[1], [0], [0], [1], [0, 0, 1, 1], [], []>} : vector<16x32xbf16>, vector<32x8xbf16>, vector<16x8xf32> -> vector<16x8xf32>
    %cst_48 = arith.constant 0.353553385 : f32
    %98 = vector.broadcast %cst_48 : f32 to vector<16x8xf32>
    %99 = arith.mulf %97, %98 : vector<16x8xf32>
    %100 = arith.truncf %99 : vector<16x8xf32> to vector<16x8xbf16>
    %101 = vector.shape_cast %100 : vector<16x8xbf16> to vector<2x8x8xbf16>
    %c1_49 = arith.constant 1 : index
    %c0_50 = arith.constant 0 : index
    %c0_51 = arith.constant 0 : index
    %102 = vector.load %arg8[%c1_49, %c0_50, %c0_51] : memref<4x32x8xbf16, #tpu.memory_space<vmem>>, vector<1x32x8xbf16>
    %103 = vector.shape_cast %102 : vector<1x32x8xbf16> to vector<32x8xbf16>
    %cst_52 = arith.constant dense<0.000000e+00> : vector<32x8xf32>
    %104 = tpu.matmul %57, %103, %cst_52 {dimension_numbers = #tpu.dot_dimension_numbers<[1], [0], [0], [1], [0, 0, 1, 1], [], []>} : vector<32x32xbf16>, vector<32x8xbf16>, vector<32x8xf32> -> vector<32x8xf32>
    %105 = arith.truncf %104 : vector<32x8xf32> to vector<32x8xbf16>
    %106 = vector.shape_cast %105 : vector<32x8xbf16> to vector<2x16x8xbf16>
    %c1_53 = arith.constant 1 : index
    %c0_54 = arith.constant 0 : index
    %c0_55 = arith.constant 0 : index
    %107 = vector.load %arg9[%c1_53, %c0_54, %c0_55] : memref<4x32x8xbf16, #tpu.memory_space<vmem>>, vector<1x32x8xbf16>
    %108 = vector.shape_cast %107 : vector<1x32x8xbf16> to vector<32x8xbf16>
    %cst_56 = arith.constant dense<0.000000e+00> : vector<32x8xf32>
    %109 = tpu.matmul %57, %108, %cst_56 {dimension_numbers = #tpu.dot_dimension_numbers<[1], [0], [0], [1], [0, 0, 1, 1], [], []>} : vector<32x32xbf16>, vector<32x8xbf16>, vector<32x8xf32> -> vector<32x8xf32>
    %110 = arith.truncf %109 : vector<32x8xf32> to vector<32x8xbf16>
    %111 = vector.shape_cast %110 : vector<32x8xbf16> to vector<2x16x8xbf16>
    "tpu.trace_start"() <{level = 10 : i32, message = "bqd,bkd->bqk"}> : () -> ()
    %cst_57 = arith.constant dense<0.000000e+00> : vector<2x8x16xf32>
    %112 = tpu.matmul %101, %106, %cst_57 {dimension_numbers = #tpu.dot_dimension_numbers<[2], [2], [1], [1], [0, 0, 0, 1, 1, 1], [0], [0]>} : vector<2x8x8xbf16>, vector<2x16x8xbf16>, vector<2x8x16xf32> -> vector<2x8x16xf32>
    "tpu.trace_stop"() : () -> ()
    %cst_58 = arith.constant dense<0xFF800000> : vector<2x8xf32>
    %113 = vector.multi_reduction <maximumf>, %112, %cst_58 [2] : vector<2x8x16xf32> to vector<2x8xf32>
    %114 = vector.shape_cast %113 : vector<2x8xf32> to vector<2x8x1xf32>
    %115 = vector.broadcast %114 : vector<2x8x1xf32> to vector<2x8x16xf32>
    %116 = arith.subf %112, %115 : vector<2x8x16xf32>
    %117 = math.exp %116 : vector<2x8x16xf32>
    %cst_59 = arith.constant dense<0.000000e+00> : vector<2x8xf32>
    %118 = vector.multi_reduction <add>, %117, %cst_59 [2] : vector<2x8x16xf32> to vector<2x8xf32>
    %119 = vector.shape_cast %118 : vector<2x8xf32> to vector<2x8x1xf32>
    %120 = tpu.reciprocal %119 {approx = true} : vector<2x8x1xf32> -> vector<2x8x1xf32>
    %121 = vector.broadcast %120 : vector<2x8x1xf32> to vector<2x8x16xf32>
    %122 = arith.mulf %117, %121 : vector<2x8x16xf32>
    %123 = arith.truncf %122 : vector<2x8x16xf32> to vector<2x8x16xbf16>
    "tpu.trace_start"() <{level = 10 : i32, message = "bqk,bkd->bqd"}> : () -> ()
    %cst_60 = arith.constant dense<0.000000e+00> : vector<2x8x8xf32>
    %124 = tpu.matmul %123, %111, %cst_60 {dimension_numbers = #tpu.dot_dimension_numbers<[2], [1], [1], [2], [0, 0, 0, 1, 1, 2], [0], [0]>} : vector<2x8x16xbf16>, vector<2x16x8xbf16>, vector<2x8x8xf32> -> vector<2x8x8xf32>
    "tpu.trace_stop"() : () -> ()
    %125 = vector.shape_cast %124 : vector<2x8x8xf32> to vector<16x8xf32>
    %126 = arith.truncf %125 : vector<16x8xf32> to vector<16x8xbf16>
    %c8 = arith.constant 8 : index
    %c0_61 = arith.constant 0 : index
    %127 = vector.load %arg10[%c8, %c0_61] : memref<32x32xbf16, #tpu.memory_space<vmem>>, vector<8x32xbf16>
    %cst_62 = arith.constant dense<0.000000e+00> : vector<16x32xf32>
    %128 = tpu.matmul %126, %127, %cst_62 {dimension_numbers = #tpu.dot_dimension_numbers<[1], [0], [0], [1], [0, 0, 1, 1], [], []>} : vector<16x8xbf16>, vector<8x32xbf16>, vector<16x32xf32> -> vector<16x32xf32>
    %129 = arith.addf %94, %128 : vector<16x32xf32>
    %c2 = arith.constant 2 : index
    %c0_63 = arith.constant 0 : index
    %c0_64 = arith.constant 0 : index
    %130 = vector.load %arg7[%c2, %c0_63, %c0_64] : memref<4x32x8xbf16, #tpu.memory_space<vmem>>, vector<1x32x8xbf16>
    %131 = vector.shape_cast %130 : vector<1x32x8xbf16> to vector<32x8xbf16>
    %cst_65 = arith.constant dense<0.000000e+00> : vector<16x8xf32>
    %132 = tpu.matmul %52, %131, %cst_65 {dimension_numbers = #tpu.dot_dimension_numbers<[1], [0], [0], [1], [0, 0, 1, 1], [], []>} : vector<16x32xbf16>, vector<32x8xbf16>, vector<16x8xf32> -> vector<16x8xf32>
    %cst_66 = arith.constant 0.353553385 : f32
    %133 = vector.broadcast %cst_66 : f32 to vector<16x8xf32>
    %134 = arith.mulf %132, %133 : vector<16x8xf32>
    %135 = arith.truncf %134 : vector<16x8xf32> to vector<16x8xbf16>
    %136 = vector.shape_cast %135 : vector<16x8xbf16> to vector<2x8x8xbf16>
    %c2_67 = arith.constant 2 : index
    %c0_68 = arith.constant 0 : index
    %c0_69 = arith.constant 0 : index
    %137 = vector.load %arg8[%c2_67, %c0_68, %c0_69] : memref<4x32x8xbf16, #tpu.memory_space<vmem>>, vector<1x32x8xbf16>
    %138 = vector.shape_cast %137 : vector<1x32x8xbf16> to vector<32x8xbf16>
    %cst_70 = arith.constant dense<0.000000e+00> : vector<32x8xf32>
    %139 = tpu.matmul %57, %138, %cst_70 {dimension_numbers = #tpu.dot_dimension_numbers<[1], [0], [0], [1], [0, 0, 1, 1], [], []>} : vector<32x32xbf16>, vector<32x8xbf16>, vector<32x8xf32> -> vector<32x8xf32>
    %140 = arith.truncf %139 : vector<32x8xf32> to vector<32x8xbf16>
    %141 = vector.shape_cast %140 : vector<32x8xbf16> to vector<2x16x8xbf16>
    %c2_71 = arith.constant 2 : index
    %c0_72 = arith.constant 0 : index
    %c0_73 = arith.constant 0 : index
    %142 = vector.load %arg9[%c2_71, %c0_72, %c0_73] : memref<4x32x8xbf16, #tpu.memory_space<vmem>>, vector<1x32x8xbf16>
    %143 = vector.shape_cast %142 : vector<1x32x8xbf16> to vector<32x8xbf16>
    %cst_74 = arith.constant dense<0.000000e+00> : vector<32x8xf32>
    %144 = tpu.matmul %57, %143, %cst_74 {dimension_numbers = #tpu.dot_dimension_numbers<[1], [0], [0], [1], [0, 0, 1, 1], [], []>} : vector<32x32xbf16>, vector<32x8xbf16>, vector<32x8xf32> -> vector<32x8xf32>
    %145 = arith.truncf %144 : vector<32x8xf32> to vector<32x8xbf16>
    %146 = vector.shape_cast %145 : vector<32x8xbf16> to vector<2x16x8xbf16>
    "tpu.trace_start"() <{level = 10 : i32, message = "bqd,bkd->bqk"}> : () -> ()
    %cst_75 = arith.constant dense<0.000000e+00> : vector<2x8x16xf32>
    %147 = tpu.matmul %136, %141, %cst_75 {dimension_numbers = #tpu.dot_dimension_numbers<[2], [2], [1], [1], [0, 0, 0, 1, 1, 1], [0], [0]>} : vector<2x8x8xbf16>, vector<2x16x8xbf16>, vector<2x8x16xf32> -> vector<2x8x16xf32>
    "tpu.trace_stop"() : () -> ()
    %cst_76 = arith.constant dense<0xFF800000> : vector<2x8xf32>
    %148 = vector.multi_reduction <maximumf>, %147, %cst_76 [2] : vector<2x8x16xf32> to vector<2x8xf32>
    %149 = vector.shape_cast %148 : vector<2x8xf32> to vector<2x8x1xf32>
    %150 = vector.broadcast %149 : vector<2x8x1xf32> to vector<2x8x16xf32>
    %151 = arith.subf %147, %150 : vector<2x8x16xf32>
    %152 = math.exp %151 : vector<2x8x16xf32>
    %cst_77 = arith.constant dense<0.000000e+00> : vector<2x8xf32>
    %153 = vector.multi_reduction <add>, %152, %cst_77 [2] : vector<2x8x16xf32> to vector<2x8xf32>
    %154 = vector.shape_cast %153 : vector<2x8xf32> to vector<2x8x1xf32>
    %155 = tpu.reciprocal %154 {approx = true} : vector<2x8x1xf32> -> vector<2x8x1xf32>
    %156 = vector.broadcast %155 : vector<2x8x1xf32> to vector<2x8x16xf32>
    %157 = arith.mulf %152, %156 : vector<2x8x16xf32>
    %158 = arith.truncf %157 : vector<2x8x16xf32> to vector<2x8x16xbf16>
    "tpu.trace_start"() <{level = 10 : i32, message = "bqk,bkd->bqd"}> : () -> ()
    %cst_78 = arith.constant dense<0.000000e+00> : vector<2x8x8xf32>
    %159 = tpu.matmul %158, %146, %cst_78 {dimension_numbers = #tpu.dot_dimension_numbers<[2], [1], [1], [2], [0, 0, 0, 1, 1, 2], [0], [0]>} : vector<2x8x16xbf16>, vector<2x16x8xbf16>, vector<2x8x8xf32> -> vector<2x8x8xf32>
    "tpu.trace_stop"() : () -> ()
    %160 = vector.shape_cast %159 : vector<2x8x8xf32> to vector<16x8xf32>
    %161 = arith.truncf %160 : vector<16x8xf32> to vector<16x8xbf16>
    %c16 = arith.constant 16 : index
    %c0_79 = arith.constant 0 : index
    %162 = vector.load %arg10[%c16, %c0_79] : memref<32x32xbf16, #tpu.memory_space<vmem>>, vector<8x32xbf16>
    %cst_80 = arith.constant dense<0.000000e+00> : vector<16x32xf32>
    %163 = tpu.matmul %161, %162, %cst_80 {dimension_numbers = #tpu.dot_dimension_numbers<[1], [0], [0], [1], [0, 0, 1, 1], [], []>} : vector<16x8xbf16>, vector<8x32xbf16>, vector<16x32xf32> -> vector<16x32xf32>
    %164 = arith.addf %129, %163 : vector<16x32xf32>
    %c3 = arith.constant 3 : index
    %c0_81 = arith.constant 0 : index
    %c0_82 = arith.constant 0 : index
    %165 = vector.load %arg7[%c3, %c0_81, %c0_82] : memref<4x32x8xbf16, #tpu.memory_space<vmem>>, vector<1x32x8xbf16>
    %166 = vector.shape_cast %165 : vector<1x32x8xbf16> to vector<32x8xbf16>
    %cst_83 = arith.constant dense<0.000000e+00> : vector<16x8xf32>
    %167 = tpu.matmul %52, %166, %cst_83 {dimension_numbers = #tpu.dot_dimension_numbers<[1], [0], [0], [1], [0, 0, 1, 1], [], []>} : vector<16x32xbf16>, vector<32x8xbf16>, vector<16x8xf32> -> vector<16x8xf32>
    %cst_84 = arith.constant 0.353553385 : f32
    %168 = vector.broadcast %cst_84 : f32 to vector<16x8xf32>
    %169 = arith.mulf %167, %168 : vector<16x8xf32>
    %170 = arith.truncf %169 : vector<16x8xf32> to vector<16x8xbf16>
    %171 = vector.shape_cast %170 : vector<16x8xbf16> to vector<2x8x8xbf16>
    %c3_85 = arith.constant 3 : index
    %c0_86 = arith.constant 0 : index
    %c0_87 = arith.constant 0 : index
    %172 = vector.load %arg8[%c3_85, %c0_86, %c0_87] : memref<4x32x8xbf16, #tpu.memory_space<vmem>>, vector<1x32x8xbf16>
    %173 = vector.shape_cast %172 : vector<1x32x8xbf16> to vector<32x8xbf16>
    %cst_88 = arith.constant dense<0.000000e+00> : vector<32x8xf32>
    %174 = tpu.matmul %57, %173, %cst_88 {dimension_numbers = #tpu.dot_dimension_numbers<[1], [0], [0], [1], [0, 0, 1, 1], [], []>} : vector<32x32xbf16>, vector<32x8xbf16>, vector<32x8xf32> -> vector<32x8xf32>
    %175 = arith.truncf %174 : vector<32x8xf32> to vector<32x8xbf16>
    %176 = vector.shape_cast %175 : vector<32x8xbf16> to vector<2x16x8xbf16>
    %c3_89 = arith.constant 3 : index
    %c0_90 = arith.constant 0 : index
    %c0_91 = arith.constant 0 : index
    %177 = vector.load %arg9[%c3_89, %c0_90, %c0_91] : memref<4x32x8xbf16, #tpu.memory_space<vmem>>, vector<1x32x8xbf16>
    %178 = vector.shape_cast %177 : vector<1x32x8xbf16> to vector<32x8xbf16>
    %cst_92 = arith.constant dense<0.000000e+00> : vector<32x8xf32>
    %179 = tpu.matmul %57, %178, %cst_92 {dimension_numbers = #tpu.dot_dimension_numbers<[1], [0], [0], [1], [0, 0, 1, 1], [], []>} : vector<32x32xbf16>, vector<32x8xbf16>, vector<32x8xf32> -> vector<32x8xf32>
    %180 = arith.truncf %179 : vector<32x8xf32> to vector<32x8xbf16>
    %181 = vector.shape_cast %180 : vector<32x8xbf16> to vector<2x16x8xbf16>
    "tpu.trace_start"() <{level = 10 : i32, message = "bqd,bkd->bqk"}> : () -> ()
    %cst_93 = arith.constant dense<0.000000e+00> : vector<2x8x16xf32>
    %182 = tpu.matmul %171, %176, %cst_93 {dimension_numbers = #tpu.dot_dimension_numbers<[2], [2], [1], [1], [0, 0, 0, 1, 1, 1], [0], [0]>} : vector<2x8x8xbf16>, vector<2x16x8xbf16>, vector<2x8x16xf32> -> vector<2x8x16xf32>
    "tpu.trace_stop"() : () -> ()
    %cst_94 = arith.constant dense<0xFF800000> : vector<2x8xf32>
    %183 = vector.multi_reduction <maximumf>, %182, %cst_94 [2] : vector<2x8x16xf32> to vector<2x8xf32>
    %184 = vector.shape_cast %183 : vector<2x8xf32> to vector<2x8x1xf32>
    %185 = vector.broadcast %184 : vector<2x8x1xf32> to vector<2x8x16xf32>
    %186 = arith.subf %182, %185 : vector<2x8x16xf32>
    %187 = math.exp %186 : vector<2x8x16xf32>
    %cst_95 = arith.constant dense<0.000000e+00> : vector<2x8xf32>
    %188 = vector.multi_reduction <add>, %187, %cst_95 [2] : vector<2x8x16xf32> to vector<2x8xf32>
    %189 = vector.shape_cast %188 : vector<2x8xf32> to vector<2x8x1xf32>
    %190 = tpu.reciprocal %189 {approx = true} : vector<2x8x1xf32> -> vector<2x8x1xf32>
    %191 = vector.broadcast %190 : vector<2x8x1xf32> to vector<2x8x16xf32>
    %192 = arith.mulf %187, %191 : vector<2x8x16xf32>
    %193 = arith.truncf %192 : vector<2x8x16xf32> to vector<2x8x16xbf16>
    "tpu.trace_start"() <{level = 10 : i32, message = "bqk,bkd->bqd"}> : () -> ()
    %cst_96 = arith.constant dense<0.000000e+00> : vector<2x8x8xf32>
    %194 = tpu.matmul %193, %181, %cst_96 {dimension_numbers = #tpu.dot_dimension_numbers<[2], [1], [1], [2], [0, 0, 0, 1, 1, 2], [0], [0]>} : vector<2x8x16xbf16>, vector<2x16x8xbf16>, vector<2x8x8xf32> -> vector<2x8x8xf32>
    "tpu.trace_stop"() : () -> ()
    %195 = vector.shape_cast %194 : vector<2x8x8xf32> to vector<16x8xf32>
    %196 = arith.truncf %195 : vector<16x8xf32> to vector<16x8xbf16>
    %c24 = arith.constant 24 : index
    %c0_97 = arith.constant 0 : index
    %197 = vector.load %arg10[%c24, %c0_97] : memref<32x32xbf16, #tpu.memory_space<vmem>>, vector<8x32xbf16>
    %cst_98 = arith.constant dense<0.000000e+00> : vector<16x32xf32>
    %198 = tpu.matmul %196, %197, %cst_98 {dimension_numbers = #tpu.dot_dimension_numbers<[1], [0], [0], [1], [0, 0, 1, 1], [], []>} : vector<16x8xbf16>, vector<8x32xbf16>, vector<16x32xf32> -> vector<16x32xf32>
    %199 = arith.addf %164, %198 : vector<16x32xf32>
    %c0_99 = arith.constant 0 : index
    %c0_100 = arith.constant 0 : index
    %200 = vector.load %arg11[%c0_99, %c0_100] : memref<1x32xf32, #tpu.memory_space<vmem>>, vector<1x32xf32>
    %201 = vector.broadcast %200 : vector<1x32xf32> to vector<16x32xf32>
    %202 = arith.addf %199, %201 : vector<16x32xf32>
    %203 = arith.addf %27, %202 : vector<16x32xf32>
    %c0_101 = arith.constant 0 : index
    %c0_102 = arith.constant 0 : index
    %204 = vector.load %arg12[%c0_101, %c0_102] : memref<1x32xf32, #tpu.memory_space<vmem>>, vector<1x32xf32>
    %c0_103 = arith.constant 0 : index
    %c0_104 = arith.constant 0 : index
    %205 = vector.load %arg13[%c0_103, %c0_104] : memref<1x32xf32, #tpu.memory_space<vmem>>, vector<1x32xf32>
    %cst_105 = arith.constant dense<0.000000e+00> : vector<16xf32>
    %206 = vector.multi_reduction <add>, %203, %cst_105 [1] : vector<16x32xf32> to vector<16xf32>
    %207 = vector.shape_cast %206 : vector<16xf32> to vector<16x1xf32>
    %cst_106 = arith.constant 3.200000e+01 : f32
    %208 = vector.broadcast %cst_106 : f32 to vector<16x1xf32>
    %209 = arith.divf %207, %208 : vector<16x1xf32>
    %210 = vector.broadcast %209 : vector<16x1xf32> to vector<16x32xf32>
    %211 = arith.subf %203, %210 : vector<16x32xf32>
    %212 = arith.mulf %211, %211 : vector<16x32xf32>
    %cst_107 = arith.constant dense<0.000000e+00> : vector<16xf32>
    %213 = vector.multi_reduction <add>, %212, %cst_107 [1] : vector<16x32xf32> to vector<16xf32>
    %214 = vector.shape_cast %213 : vector<16xf32> to vector<16x1xf32>
    %cst_108 = arith.constant 3.200000e+01 : f32
    %215 = vector.broadcast %cst_108 : f32 to vector<16x1xf32>
    %216 = arith.divf %214, %215 : vector<16x1xf32>
    %217 = vector.broadcast %209 : vector<16x1xf32> to vector<16x32xf32>
    %218 = arith.subf %203, %217 : vector<16x32xf32>
    %cst_109 = arith.constant 9.99999974E-6 : f32
    %219 = vector.broadcast %cst_109 : f32 to vector<16x1xf32>
    %220 = arith.addf %216, %219 : vector<16x1xf32>
    %221 = math.rsqrt %220 : vector<16x1xf32>
    %222 = vector.broadcast %221 : vector<16x1xf32> to vector<16x32xf32>
    %223 = arith.mulf %218, %222 : vector<16x32xf32>
    %224 = vector.broadcast %204 : vector<1x32xf32> to vector<16x32xf32>
    %225 = arith.mulf %223, %224 : vector<16x32xf32>
    %226 = vector.broadcast %205 : vector<1x32xf32> to vector<16x32xf32>
    %227 = arith.addf %225, %226 : vector<16x32xf32>
    %228 = arith.truncf %227 : vector<16x32xf32> to vector<16x32xbf16>
    %c0_110 = arith.constant 0 : index
    %c0_111 = arith.constant 0 : index
    %229 = vector.load %arg14[%c0_110, %c0_111] : memref<32x32xbf16, #tpu.memory_space<vmem>>, vector<32x32xbf16>
    %cst_112 = arith.constant dense<0.000000e+00> : vector<16x32xf32>
    %230 = tpu.matmul %228, %229, %cst_112 {dimension_numbers = #tpu.dot_dimension_numbers<[1], [0], [0], [1], [0, 0, 1, 1], [], []>} : vector<16x32xbf16>, vector<32x32xbf16>, vector<16x32xf32> -> vector<16x32xf32>
    %c0_113 = arith.constant 0 : index
    %c0_114 = arith.constant 0 : index
    %231 = vector.load %arg15[%c0_113, %c0_114] : memref<1x32xf32, #tpu.memory_space<vmem>>, vector<1x32xf32>
    %232 = vector.broadcast %231 : vector<1x32xf32> to vector<16x32xf32>
    %233 = arith.addf %230, %232 : vector<16x32xf32>
    %cst_115 = arith.constant 5.000000e-01 : f32
    %234 = vector.broadcast %cst_115 : f32 to vector<16x32xf32>
    %235 = arith.mulf %234, %233 : vector<16x32xf32>
    %cst_116 = arith.constant 0.707106769 : f32
    %236 = vector.broadcast %cst_116 : f32 to vector<16x32xf32>
    %237 = arith.mulf %233, %236 : vector<16x32xf32>
    %238 = math.erf %237 : vector<16x32xf32>
    %cst_117 = arith.constant 1.000000e+00 : f32
    %239 = vector.broadcast %cst_117 : f32 to vector<16x32xf32>
    %240 = arith.addf %239, %238 : vector<16x32xf32>
    %241 = arith.mulf %235, %240 : vector<16x32xf32>
    %242 = arith.truncf %241 : vector<16x32xf32> to vector<16x32xbf16>
    %c0_118 = arith.constant 0 : index
    %c0_119 = arith.constant 0 : index
    %243 = vector.load %arg16[%c0_118, %c0_119] : memref<32x32xbf16, #tpu.memory_space<vmem>>, vector<32x32xbf16>
    %cst_120 = arith.constant dense<0.000000e+00> : vector<16x32xf32>
    %244 = tpu.matmul %242, %243, %cst_120 {dimension_numbers = #tpu.dot_dimension_numbers<[1], [0], [0], [1], [0, 0, 1, 1], [], []>} : vector<16x32xbf16>, vector<32x32xbf16>, vector<16x32xf32> -> vector<16x32xf32>
    %c0_121 = arith.constant 0 : index
    %c0_122 = arith.constant 0 : index
    %245 = vector.load %arg17[%c0_121, %c0_122] : memref<1x32xf32, #tpu.memory_space<vmem>>, vector<1x32xf32>
    %246 = vector.broadcast %245 : vector<1x32xf32> to vector<16x32xf32>
    %247 = arith.addf %244, %246 : vector<16x32xf32>
    %248 = arith.addf %203, %247 : vector<16x32xf32>
    %249 = vector.shape_cast %248 : vector<16x32xf32> to vector<2x8x32xf32>
    %c0_123 = arith.constant 0 : index
    %c0_124 = arith.constant 0 : index
    %c0_125 = arith.constant 0 : index
    %250 = vector.load %arg18[%c0_123, %c0_124, %c0_125] : memref<2x8x32xf32, #tpu.memory_space<vmem>>, vector<2x8x32xf32>
    tpu.vector_store %arg18[%c0_123, %c0_124, %c0_125], %249 {strides = array<i32>} : memref<2x8x32xf32, #tpu.memory_space<vmem>>, vector<2x8x32xf32>,
    return
  }
  func.func @transform_0(%arg0: i32) -> (i32, i32, i32) {
    %c0_i32 = arith.constant 0 : i32
    %c0_i32_0 = arith.constant 0 : i32
    %c0_i32_1 = arith.constant 0 : i32
    return %arg0, %c0_i32, %c0_i32_0 : i32, i32, i32
  }
  func.func @transform_1(%arg0: i32) -> (i32, i32, i32) {
    %c0_i32 = arith.constant 0 : i32
    %c0_i32_0 = arith.constant 0 : i32
    %c0_i32_1 = arith.constant 0 : i32
    return %arg0, %c0_i32, %c0_i32_0 : i32, i32, i32
  }
  func.func @transform_2(%arg0: i32) -> (i32, i32) {
    %c0_i32 = arith.constant 0 : i32
    %c0_i32_0 = arith.constant 0 : i32
    %c0_i32_1 = arith.constant 0 : i32
    return %c0_i32, %c0_i32_0 : i32, i32
  }
  func.func @transform_3(%arg0: i32) -> (i32, i32) {
    %c0_i32 = arith.constant 0 : i32
    %c0_i32_0 = arith.constant 0 : i32
    %c0_i32_1 = arith.constant 0 : i32
    return %c0_i32, %c0_i32_0 : i32, i32
  }
  func.func @transform_4(%arg0: i32) -> (i32, i32) {
    %c0_i32 = arith.constant 0 : i32
    %c0_i32_0 = arith.constant 0 : i32
    %c0_i32_1 = arith.constant 0 : i32
    return %c0_i32, %c0_i32_0 : i32, i32
  }
  func.func @transform_5(%arg0: i32) -> (i32, i32) {
    %c0_i32 = arith.constant 0 : i32
    %c0_i32_0 = arith.constant 0 : i32
    %c0_i32_1 = arith.constant 0 : i32
    return %c0_i32, %c0_i32_0 : i32, i32
  }
  func.func @transform_6(%arg0: i32) -> (i32, i32, i32) {
    %c0_i32 = arith.constant 0 : i32
    %c0_i32_0 = arith.constant 0 : i32
    %c0_i32_1 = arith.constant 0 : i32
    %c0_i32_2 = arith.constant 0 : i32
    return %c0_i32, %c0_i32_0, %c0_i32_1 : i32, i32, i32
  }
  func.func @transform_7(%arg0: i32) -> (i32, i32, i32) {
    %c0_i32 = arith.constant 0 : i32
    %c0_i32_0 = arith.constant 0 : i32
    %c0_i32_1 = arith.constant 0 : i32
    %c0_i32_2 = arith.constant 0 : i32
    return %c0_i32, %c0_i32_0, %c0_i32_1 : i32, i32, i32
  }
  func.func @transform_8(%arg0: i32) -> (i32, i32, i32) {
    %c0_i32 = arith.constant 0 : i32
    %c0_i32_0 = arith.constant 0 : i32
    %c0_i32_1 = arith.constant 0 : i32
    %c0_i32_2 = arith.constant 0 : i32
    return %c0_i32, %c0_i32_0, %c0_i32_1 : i32, i32, i32
  }
  func.func @transform_9(%arg0: i32) -> (i32, i32) {
    %c0_i32 = arith.constant 0 : i32
    %c0_i32_0 = arith.constant 0 : i32
    %c0_i32_1 = arith.constant 0 : i32
    return %c0_i32, %c0_i32_0 : i32, i32
  }
  func.func @transform_10(%arg0: i32) -> (i32, i32) {
    %c0_i32 = arith.constant 0 : i32
    %c0_i32_0 = arith.constant 0 : i32
    %c0_i32_1 = arith.constant 0 : i32
    return %c0_i32, %c0_i32_0 : i32, i32
  }
  func.func @transform_11(%arg0: i32) -> (i32, i32) {
    %c0_i32 = arith.constant 0 : i32
    %c0_i32_0 = arith.constant 0 : i32
    %c0_i32_1 = arith.constant 0 : i32
    return %c0_i32, %c0_i32_0 : i32, i32
  }
  func.func @transform_12(%arg0: i32) -> (i32, i32) {
    %c0_i32 = arith.constant 0 : i32
    %c0_i32_0 = arith.constant 0 : i32
    %c0_i32_1 = arith.constant 0 : i32
    return %c0_i32, %c0_i32_0 : i32, i32
  }
  func.func @transform_13(%arg0: i32) -> (i32, i32) {
    %c0_i32 = arith.constant 0 : i32
    %c0_i32_0 = arith.constant 0 : i32
    %c0_i32_1 = arith.constant 0 : i32
    return %c0_i32, %c0_i32_0 : i32, i32
  }
  func.func @transform_14(%arg0: i32) -> (i32, i32) {
    %c0_i32 = arith.constant 0 : i32
    %c0_i32_0 = arith.constant 0 : i32
    %c0_i32_1 = arith.constant 0 : i32
    return %c0_i32, %c0_i32_0 : i32, i32
  }
  func.func @transform_15(%arg0: i32) -> (i32, i32) {
    %c0_i32 = arith.constant 0 : i32
    %c0_i32_0 = arith.constant 0 : i32
    %c0_i32_1 = arith.constant 0 : i32
    return %c0_i32, %c0_i32_0 : i32, i32
  }
  func.func @transform_16(%arg0: i32) -> (i32, i32) {
    %c0_i32 = arith.constant 0 : i32
    %c0_i32_0 = arith.constant 0 : i32
    %c0_i32_1 = arith.constant 0 : i32
    return %c0_i32, %c0_i32_0 : i32, i32
  }
  func.func @transform_17(%arg0: i32) -> (i32, i32, i32) {
    %c0_i32 = arith.constant 0 : i32
    %c0_i32_0 = arith.constant 0 : i32
    %c0_i32_1 = arith.constant 0 : i32
    return %arg0, %c0_i32, %c0_i32_0 : i32, i32, i32
  }
}

</mosaic_0001>

<bundles_post_ra>
// kernel: tpu_custom_call.1
= control target key start
LH: loop header
LB: loop body
LE: loop exit
PB: predicated region body
PF: predicated region fallthrough
CT: control target
= control target key end

     0   :  { %s2273_s0 = inlined_call_operand.vmem [shape: f32[2,8,32], index: 0, kind: input, shape index: {}]   ;;  %s2274_s1 = inlined_call_operand.vmem [shape: f32[2,8,32], index: 1, kind: input, shape index: {}]   ;;  %s2275_s2 = inlined_call_operand.vmem [shape: f32[1,32], index: 2, kind: input, shape index: {}]   ;;  %s2276_s3 = inlined_call_operand.vmem [shape: f32[1,32], index: 3, kind: input, shape index: {}]   ;;  %s2277_s4 = inlined_call_operand.vmem [shape: f32[1,32], index: 4, kind: input, shape index: {}]   ;;  %s2278_s5 = inlined_call_operand.vmem [shape: f32[1,32], index: 5, kind: input, shape index: {}]   ;;  %s2279_s6 = inlined_call_operand.vmem [shape: bf16[4,32,8], index: 6, kind: input, shape index: {}]   ;;  %s2280_s7 = inlined_call_operand.vmem [shape: bf16[4,32,8], index: 7, kind: input, shape index: {}]   ;;  %s2281_s8 = inlined_call_operand.vmem [shape: bf16[4,32,8], index: 8, kind: input, shape index: {}]   ;;  %s2282_s9 = inlined_call_operand.vmem [shape: bf16[32,32], index: 9, kind: input, shape index: {}]   ;;  %s2283_s10 = inlined_call_operand.vmem [shape: f32[1,32], index: 10, kind: input, shape index: {}]   ;;  %s2284_s11 = inlined_call_operand.vmem [shape: f32[1,32], index: 11, kind: input, shape index: {}]   ;;  %s2285_s12 = inlined_call_operand.vmem [shape: f32[1,32], index: 12, kind: input, shape index: {}]   ;;  %s2286_s13 = inlined_call_operand.vmem [shape: bf16[32,32], index: 13, kind: input, shape index: {}]   ;;  %s2287_s14 = inlined_call_operand.vmem [shape: f32[1,32], index: 14, kind: input, shape index: {}]   ;;  %s2288_s15 = inlined_call_operand.vmem [shape: bf16[32,32], index: 15, kind: input, shape index: {}]   ;;  %s2289_s16 = inlined_call_operand.vmem [shape: f32[1,32], index: 16, kind: input, shape index: {}]   ;;  %s2290_s17 = inlined_call_operand.hbm [shape: f32[2,8,32], index: 17, kind: output, shape index: {}]  }
   0x1   :  { %2293 = sst [smem:[#allocation5_spill]] %s2273_s0 }
   0x2   :  { %2294 = sst [smem:[#allocation6_spill]] %s2274_s1 }
   0x3   :  { %s2295_s26 = sld [smem:[#allocation6_spill]]  ;;  %vm64_vm0 = vcmask 261120  }
   0x4   :  { %s2296_s30 = sld [smem:[#allocation5_spill]] }
   0x9   :  { %v61_v0 = vld [vmem:[%s2295_s26 + $0x8] sm:$0xff]  ;;  %v60_v1 = vld [vmem:[%s2295_s26] sm:$0xff] }
   0xa   :  { %v131_v2 = vsel %vm64_vm0, %v61_v0, 0.0  ;;  %v128_v3 = vsel %vm64_vm0, %v60_v1, 0.0  ;;  %v59_v4 = vld [vmem:[%s2296_s30 + $0x8] sm:$0xff]  ;;  %v58_v5 = vld [vmem:[%s2296_s30] sm:$0xff] }
   0xb   :  { %132 = vadd.xlane.f32.xlu1 %v131_v2  ;;  %129 = vadd.xlane.f32.xlu0 %v128_v3 }
   0xc   :  { %22 = vsyncpa [#allocation3], 0  ;;  %v68_v6 = vsel %vm64_vm0, %v59_v4, 0.0  ;;  %v65_v7 = vsel %vm64_vm0, %v58_v5, 0.0  ;;  %v1828_v8 = vmov 32.0   ;;  %v1714_v37 = vld [vmem:[%s2280_s7 + $0x8] sm:$0xff] }
   0xd   :  { %1752 = vrcp.f32 %v1828_v8  ;;  %v1716_v38 = vld [vmem:[%s2281_s8 + $0x8] sm:$0xff]  ;;  %271 = vmatpush.bf16.msra.mxu1 %v1714_v37  ;;  %v1713_v44 = vld [vmem:[%s2280_s7] sm:$0xff]  ;;  %vm192_vm14 = vcmask 1043456   ;;  %vm332_vm15 = vcmask 64512   ;;  %s1496_s24 = sshll.u32 %s2290_s17, 4  ;;  %s1831_s25 = smov 8   ;;  %s1497_s24 = int_to_ptr.hbm [resolvable:$true] %s1496_s24 }
   0xe   :  { %310 = vmatpush.bf16.msra.mxu2 %v1716_v38  ;;  %v1712_v43 = vld [vmem:[%s2279_s6 + $0x8] sm:$0xff]  ;;  %v1715_v45 = vld [vmem:[%s2281_s8] sm:$0xff] }
   0xf   :  { %233 = vmatpush.bf16.msra.mxu0 %v1712_v43  ;;  %v1711_v46 = vld [vmem:[%s2279_s6] sm:$0xff] }
  0x10   :  { %v1743_v2 = vld [vmem:[%s2277_s4] ss:$0 sm:$0xff] }
  0x11   :  { %272 = vmatpush.bf16.msra.mxu1 %v1713_v44 }
  0x12   :  { %311 = vmatpush.bf16.msra.mxu2 %v1715_v45 }
  0x13   :  { %69 = vadd.xlane.f32.xlu1 %v68_v6  ;;  %66 = vadd.xlane.f32.xlu0 %v65_v7  ;;  %v1753_v9 = vpop.eup %1752  ;;  %v1744_v6 = vld [vmem:[%s2278_s5] ss:$0 sm:$0xff]  ;;  %s1829_s5 = smov [#allocation2]  }
  0x14   :  { %v72_v10 = vmul.f32 32.0, %v1753_v9  ;;  %vm76_vm1 = vweird.f32 %v1753_v9  ;;  %234 = vmatpush.bf16.msra.mxu0 %v1711_v46  ;;  %s1494_s21 = sshll.u32 %s1829_s5, 4  ;;  %s1495_s21 = int_to_ptr.vmem [resolvable:$true] %s1494_s21 }
  0x16   :  { %v73_v11 = vsub.f32 1.0, %v72_v10 }
  0x18   :  { %v74_v12 = vmul.f32 %v1753_v9, %v73_v11 }
  0x1a   :  { %v75_v13 = vadd.f32 %v1753_v9, %v74_v12 }
  0x1c   :  { %v1938_v14 = vsel %vm76_vm1, %v1753_v9, %v75_v13  ;;  %v1710_v13 = vld [vmem:[%s2282_s9 + $0x8] sm:$0xff]  ;;  %vm376_vm1 = vcmask 130048  }
  0x1d   :  { %485 = vmatpush.bf16.msrb.mxu2 %v1710_v13 }
  0x7e   :  { %v133_v15 = vpop.xlane.xlu1 %132  ;;  %v130_v16 = vpop.xlane.xlu0 %129 }
  0x7f   :  { %v135_v17 = vmul.f32 %v133_v15, %v1938_v14  ;;  %v134_v18 = vmul.f32 %v130_v16, %v1938_v14 }
  0x81   :  { %v1942_v19 = vsub.f32 %v61_v0, %v135_v17  ;;  %v1944_v20 = vsub.f32 %v60_v1, %v134_v18 }
  0x83   :  { %v138_v21 = vmul.f32 %v1944_v20, %v1944_v20  ;;  %v139_v22 = vmul.f32 %v1942_v19, %v1942_v19 }
  0x85   :  { %v140_v23 = vsel %vm64_vm0, %v138_v21, 0.0  ;;  %v143_v24 = vsel %vm64_vm0, %v139_v22, 0.0 }
  0x86   :  { %141 = vadd.xlane.f32.xlu2 %v140_v23  ;;  %v70_v25 = vpop.xlane.xlu1 %69  ;;  %144 = vadd.xlane.f32.xlu0 %v143_v24  ;;  %v67_v26 = vpop.xlane.xlu0 %66  ;;  %v1745_v23 = vld [vmem:[%s2275_s2] ss:$0 sm:$0xff] }
  0x87   :  { %v79_v27 = vmul.f32 %v1938_v14, %v70_v25  ;;  %v78_v28 = vmul.f32 %v1938_v14, %v67_v26 }
  0x89   :  { %v1954_v29 = vsub.f32 %v59_v4, %v79_v27  ;;  %v1956_v30 = vsub.f32 %v58_v5, %v78_v28  ;;  %v1746_v28 = vld [vmem:[%s2276_s3] ss:$0 sm:$0xff] }
  0x8b   :  { %v83_v31 = vmul.f32 %v1954_v29, %v1954_v29  ;;  %v82_v32 = vmul.f32 %v1956_v30, %v1956_v30 }
  0x8d   :  { %v87_v33 = vsel %vm64_vm0, %v83_v31, 0.0  ;;  %v84_v34 = vsel %vm64_vm0, %v82_v32, 0.0 }
  0x8e   :  { %88 = vadd.xlane.f32.xlu1 %v87_v33  ;;  %85 = vadd.xlane.f32.xlu2 %v84_v34 }
  0xf9   :  { %v142_v35 = vpop.xlane.xlu2 %141  ;;  %v145_v36 = vpop.xlane.xlu0 %144 }
  0xfa   :  { %v146_v39 = vmul.f32 %v142_v35, %v1938_v14  ;;  %v147_v40 = vmul.f32 %v145_v36, %v1938_v14 }
  0xfc   :  { %v148_v41 = vadd.f32 1e-05, %v146_v39  ;;  %v149_v42 = vadd.f32 1e-05, %v147_v40 }
  0xfe   :  { %1754 = vrsqrt.f32 %v148_v41  ;;  %vm156_vm3 = vweird.f32 %v148_v41  ;;  %vm166_vm7 = vweird.f32 %v149_v42 }
  0xff   :  { %1756 = vrsqrt.f32 %v149_v42 }
 0x101   :  { %v89_v47 = vpop.xlane.xlu1 %88  ;;  %v86_v48 = vpop.xlane.xlu2 %85 }
 0x102   :  { %v91_v49 = vmul.f32 %v89_v47, %v1938_v14  ;;  %v90_v50 = vmul.f32 %v86_v48, %v1938_v14 }
 0x104   :  { %v1755_v51 = vpop.eup %1754  ;;  %v93_v52 = vadd.f32 1e-05, %v91_v49  ;;  %v92_v53 = vadd.f32 1e-05, %v90_v50 }
 0x105   :  { %v1757_v54 = vpop.eup %1756  ;;  %v151_v55 = vmul.f32 %v1755_v51, %v148_v41  ;;  %vm157_vm2 = vweird.f32 %v1755_v51 }
 0x106   :  { %v161_v56 = vmul.f32 %v1757_v54, %v149_v42  ;;  %1758 = vrsqrt.f32 %v93_v52  ;;  %vm158_vm4 = vmor %vm156_vm3, %vm157_vm2  ;;  %vm110_vm5 = vweird.f32 %v93_v52  ;;  %vm167_vm8 = vweird.f32 %v1757_v54 }
 0x107   :  { %v152_v57 = vmul.f32 %v1755_v51, %v151_v55  ;;  %1760 = vrsqrt.f32 %v92_v53  ;;  %vm1999_vm11 = vmor %vm166_vm7, %vm167_vm8  ;;  %vm100_vm12 = vweird.f32 %v92_v53 }
 0x108   :  { %v162_v58 = vmul.f32 %v1757_v54, %v161_v56 }
 0x109   :  { %v153_v59 = vmul.f32 0.5, %v152_v57 }
 0x10a   :  { %v163_v62 = vmul.f32 0.5, %v162_v58 }
 0x10b   :  { %v154_v60 = vsub.f32 1.5, %v153_v59 }
 0x10c   :  { %v1759_v61 = vpop.eup %1758  ;;  %v164_v8 = vsub.f32 1.5, %v163_v62 }
 0x10d   :  { %v1761_v63 = vpop.eup %1760  ;;  %v155_v0 = vmul.f32 %v1755_v51, %v154_v60  ;;  %v105_v1 = vmul.f32 %v1759_v61, %v93_v52  ;;  %vm111_vm6 = vweird.f32 %v1759_v61 }
 0x10e   :  { %v95_v3 = vmul.f32 %v1761_v63, %v92_v53  ;;  %v165_v17 = vmul.f32 %v1757_v54, %v164_v8  ;;  %vm112_vm9 = vmor %vm110_vm5, %vm111_vm6  ;;  %vm101_vm10 = vweird.f32 %v1761_v63 }
 0x10f   :  { %v159_v4 = vsel %vm158_vm4, %v1755_v51, %v155_v0  ;;  %v106_v5 = vmul.f32 %v1759_v61, %v105_v1  ;;  %vm102_vm13 = vmor %vm100_vm12, %vm101_vm10 }
 0x110   :  { %v170_v7 = vmul.f32 %v159_v4, %v1944_v20  ;;  %v96_v9 = vmul.f32 %v1761_v63, %v95_v3  ;;  %v1709_v20 = vld [vmem:[%s2282_s9] sm:$0xff]  ;;  %v169_v27 = vsel %vm1999_vm11, %v1757_v54, %v165_v17 }
 0x111   :  { %v107_v10 = vmul.f32 0.5, %v106_v5  ;;  %486 = vmatpush.bf16.msrb.mxu2 %v1709_v20  ;;  %v171_v36 = vmul.f32 %v169_v27, %v1942_v19 }
 0x112   :  { %v175_v11 = vmul.f32 %v1743_v2, %v170_v7  ;;  %v97_v12 = vmul.f32 0.5, %v96_v9 }
 0x113   :  { %v108_v15 = vsub.f32 1.5, %v107_v10  ;;  %v176_v42 = vmul.f32 %v1743_v2, %v171_v36 }
 0x114   :  { %v180_v16 = vadd.f32 %v1744_v6, %v175_v11  ;;  %v98_v18 = vsub.f32 1.5, %v97_v12 }
 0x115   :  { %v109_v22 = vmul.f32 %v1759_v61, %v108_v15  ;;  %v181_v19 = vadd.f32 %v1744_v6, %v176_v42 }
 0x116   :  { %v99_v24 = vmul.f32 %v1761_v63, %v98_v18  ;;  %v184_v25 = vpack.c.bf16 %v180_v16, %v180_v16 }
 0x117   :  { %v113_v26 = vsel %vm112_vm9, %v1759_v61, %v109_v22  ;;  %v185_v46 = vpack.c.bf16 %v181_v19, %v181_v19  ;;  %v1720_v19 = vld [vmem:[%s2280_s7 + $0x18] sm:$0xff] }
 0x118   :  { %v115_v31 = vmul.f32 %v113_v26, %v1954_v29  ;;  %v103_v32 = vsel %vm102_vm13, %v1761_v63, %v99_v24  ;;  %v188_v35 = vunpack.c.l.b16 %v184_v25 }
 0x119   :  { %v114_v33 = vmul.f32 %v103_v32, %v1956_v30  ;;  %v189_v47 = vunpack.c.l.b16 %v185_v46  ;;  %v1719_v46 = vld [vmem:[%s2280_s7 + $0x10] sm:$0xff] }
 0x11a   :  { %v120_v34 = vmul.f32 %v1745_v23, %v115_v31  ;;  %v190_v41 = vpack.c.b16 %v188_v35, %v188_v35 }
 0x11b   :  { %v119_v37 = vmul.f32 %v1745_v23, %v114_v33  ;;  %v191_v48 = vpack.c.b16 %v189_v47, %v189_v47 }
 0x11c   :  { %v2014_v38 = vadd.f32 %v1746_v28, %v120_v34 }
 0x11d   :  { %v2016_v39 = vadd.f32 %v1746_v28, %v119_v37 }
 0x11e   :  { %v183_v40 = vpack.c.bf16 %v2014_v38, %v2014_v38 }
 0x11f   :  { %v182_v29 = vpack.c.bf16 %v2016_v39, %v2016_v39 }
 0x120   :  { %v210_v43 = vunpack.c.l.b16 %v183_v40  ;;  %v2034_v49 = vsel %vm192_vm14, %v183_v40, %v191_v48 }
 0x121   :  { %v2023_v30 = vsel %vm192_vm14, %v182_v29, %v190_v41  ;;  %v209_v44 = vunpack.c.l.b16 %v182_v29 }
 0x122   :  { %1525 = vmatmul.msk.bf16.vlgmr.msra.gmra.mxu1 %vm64_vm0, %v2023_v30  ;;  %1535 = vmatmul.msk.bf16.vlgmr.msra.gmra.mxu2 %vm64_vm0, %v2023_v30 }
 0x123   :  { %v2029_v45 = vpack.c.b16 %v210_v43, %v209_v44  ;;  %v1718_v43 = vld [vmem:[%s2279_s6 + $0x18] sm:$0xff]  ;;  %v1717_v44 = vld [vmem:[%s2279_s6 + $0x10] sm:$0xff] }
 0x125   :  { %1516 = vmatmul.msk.bf16.vlgmr.msra.gmra.mxu0 %vm64_vm0, %v2029_v45 }
 0x132   :  { %1526 = vmatmul.msk.bf16.gmra.mxu1 %vm64_vm0, %v2034_v49  ;;  %1536 = vmatmul.msk.bf16.gmra.mxu2 %vm64_vm0, %v2034_v49 }
 0x142   :  { %1550 = vmatmul.msk.bf16.vlgmr.msrb.gmra.mxu2 %vm64_vm0, %v2029_v45 }
 0x19f   :  { %v274_v50 = vpop.f32.mrf.mxu1 }
 0x1a0   :  { %v284_v52 = vpack.c.bf16 %v274_v50, %v274_v50 }
 0x1a2   :  { %v329_v55 = vunpack.c.l.b16 %v284_v52  ;;  %v236_v59 = vpop.f32.mrf.mxu0 }
 0x1a3   :  { %v241_v0 = vmul.f32 0.35355338, %v236_v59  ;;  %v1721_v59 = vld [vmem:[%s2281_s8 + $0x10] sm:$0xff] }
 0x1a5   :  { %v313_v51 = vpop.f32.mrf.mxu2  ;;  %v243_v4 = vpack.c.bf16 %v241_v0, %v241_v0 }
 0x1a6   :  { %v323_v57 = vpack.c.bf16 %v313_v51, %v313_v51 }
 0x1a7   :  { %v276_v53 = vpop.f32.mrf.mxu1 }
 0x1a8   :  { %v285_v54 = vpack.c.bf16 %v276_v53, %v276_v53  ;;  %v403_v1 = vunpack.c.l.b16 %v323_v57 }
 0x1aa   :  { %v330_v56 = vunpack.c.l.b16 %v285_v54  ;;  %v238_v13 = vpop.f32.mrf.mxu0 }
 0x1ab   :  { %v242_v18 = vmul.f32 0.35355338, %v238_v13 }
 0x1ac   :  { %v331_v58 = vpack.c.b16 %v330_v56, %v329_v55  ;;  %v446_v56 = vld [vmem:[%s2282_s9] sm:$0xf] }
 0x1ad   :  { %v315_v60 = vpop.f32.mrf.mxu2  ;;  %v244_v23 = vpack.c.bf16 %v242_v18, %v242_v18  ;;  %v451_v57 = vsel %vm192_vm14, %v446_v56, 0 }
 0x1ae   :  { %v324_v61 = vpack.c.bf16 %v315_v60, %v315_v60  ;;  %v337_v62 = vsel %vm332_vm15, %v331_v58, 0  ;;  %460 = vmatpush.bf16.msrb.mxu1 %v451_v57  ;;  %v1722_v58 = vld [vmem:[%s2281_s8 + $0x18] sm:$0xff] }
 0x1af   :  { %v279_v63 = vpop.f32.mrf.mxu1  ;;  %346 = vmatpush.bf16.xpose.msra.mxu3 %v337_v62 }
 0x1b0   :  { %v404_v2 = vunpack.c.l.b16 %v324_v61  ;;  %v286_v6 = vpack.c.bf16 %v279_v63, %v279_v63 }
 0x1b2   :  { %v405_v3 = vpack.c.b16 %v404_v2, %v403_v1  ;;  %v354_v9 = vunpack.c.l.b16 %v286_v6  ;;  %591 = vmatpush.bf16.msra.mxu1 %v1722_v58  ;;  %v1724_v1 = vld [vmem:[%s2279_s6 + $0x28] sm:$0xff]  ;;  %v1723_v2 = vld [vmem:[%s2279_s6 + $0x20] sm:$0xff] }
 0x1b5   :  { %v318_v5 = vpop.f32.mrf.mxu2 }
 0x1b6   :  { %1537 = vmatmul.msk.bf16.vlgmr.msra.gmra.mxu3 %vm332_vm15, %v243_v4  ;;  %v325_v11 = vpack.c.bf16 %v318_v5, %v318_v5  ;;  %592 = vmatpush.bf16.msra.mxu1 %v1721_v59 }
 0x1b7   :  { %417 = vmatpush.bf16.msrb.mxu3 %v405_v3  ;;  %v281_v7 = vpop.f32.mrf.mxu1 }
 0x1b8   :  { %v287_v8 = vpack.c.bf16 %v281_v7, %v281_v7  ;;  %v425_v20 = vunpack.c.l.b16 %v325_v11 }
 0x1ba   :  { %v355_v10 = vunpack.c.l.b16 %v287_v8 }
 0x1bb   :  { %516 = vmatpush.bf16.msra.mxu3 %v1718_v43 }
 0x1bc   :  { %v356_v12 = vpack.c.b16 %v355_v10, %v354_v9 }
 0x1bd   :  { %v320_v15 = vpop.f32.mrf.mxu2 }
 0x1be   :  { %v326_v16 = vpack.c.bf16 %v320_v15, %v320_v15  ;;  %v361_v17 = vsel %vm332_vm15, %v356_v12, 0 }
 0x1bf   :  { %370 = vmatpush.bf16.xpose.msrb.mxu0 %v361_v17  ;;  %517 = vmatpush.bf16.msra.mxu3 %v1717_v44 }
 0x1c0   :  { %v426_v21 = vunpack.c.l.b16 %v326_v16 }
 0x1c2   :  { %v427_v22 = vpack.c.b16 %v426_v21, %v425_v20 }
 0x1c6   :  { %1538 = vmatmul.msk.bf16.vlgmr.msrb.gmra.mxu0 %vm332_vm15, %v244_v23 }
 0x1c7   :  { %439 = vmatpush.bf16.msra.mxu0 %v427_v22 }
 0x1cb   :  { %551 = vmatpush.bf16.msrb.mxu0 %v1720_v19 }
 0x1cf   :  { %552 = vmatpush.bf16.msrb.mxu0 %v1719_v46 }
 0x239   :  { %v348_v24 = vpop.f32.mrf.mxu3 }
 0x23a   :  { %v377_v25 = vsel %vm376_vm1, %v348_v24, -inf }
 0x23b   :  { %378 = vmax.xlane.f32.xlu0 %v377_v25 }
 0x241   :  { %v350_v26 = vpop.f32.mrf.mxu3 }
 0x243   :  { %v372_v27 = vpop.f32.mrf.mxu0 }
 0x244   :  { %v380_v28 = vsel %vm376_vm1, %v372_v27, -inf }
 0x245   :  { %381 = vmax.xlane.f32.xlu2 %v380_v28 }
 0x24b   :  { %v374_v31 = vpop.f32.mrf.mxu0 }
 0x2ae   :  { %v379_v32 = vpop.xlane.xlu0 %378 }
 0x2af   :  { %v383_v33 = vsub.f32 %v348_v24, %v379_v32 }
 0x2b1   :  { %v385_v34 = vmul.f32 1.442695, %v383_v33 }
 0x2b3   :  { %1762 = vpow2.f32 %v385_v34 }
 0x2b8   :  { %v382_v35 = vpop.xlane.xlu2 %381 }
 0x2b9   :  { %v1763_v36 = vpop.eup %1762  ;;  %v384_v37 = vsub.f32 %v372_v27, %v382_v35  ;;  %v2097_v27 = vpop.f32.mrf.mxu2 }
 0x2ba   :  { %v389_v40 = vsel %vm376_vm1, %v1763_v36, 0.0 }
 0x2bb   :  { %v387_v41 = vmul.f32 1.442695, %v384_v37  ;;  %390 = vadd.xlane.f32.xlu2 %v389_v40 }
 0x2bd   :  { %1764 = vpow2.f32 %v387_v41 }
 0x2c1   :  { %v490_v31 = vpop.f32.mrf.mxu2 }
 0x2c3   :  { %v1765_v42 = vpop.eup %1764 }
 0x2c4   :  { %v392_v29 = vsel %vm376_vm1, %v1765_v42, 0.0 }
 0x2c5   :  { %393 = vadd.xlane.f32.xlu1 %v392_v29 }
 0x32e   :  { %v391_v47 = vpop.xlane.xlu2 %390 }
 0x32f   :  { %1766 = vrcp.f32 %v391_v47 }
 0x335   :  { %v1767_v48 = vpop.eup %1766 }
 0x336   :  { %v397_v50 = vmul.f32 %v1767_v48, %v1763_v36 }
 0x338   :  { %v394_v51 = vpop.xlane.xlu1 %393  ;;  %v399_v52 = vpack.c.bf16 %v397_v50, %v397_v50 }
 0x339   :  { %1768 = vrcp.f32 %v394_v51 }
 0x33a   :  { %1539 = vmatmul.msk.bf16.vlgmr.msrb.gmra.mxu3 %vm376_vm1, %v399_v52 }
 0x33f   :  { %v1769_v53 = vpop.eup %1768 }
 0x340   :  { %v398_v54 = vmul.f32 %v1769_v53, %v1765_v42 }
 0x342   :  { %v400_v55 = vpack.c.bf16 %v398_v54, %v398_v54 }
 0x344   :  { %1540 = vmatmul.msk.bf16.vlgmr.msra.gmra.mxu0 %vm376_vm1, %v400_v55 }
 0x34a   :  { %1563 = vmatmul.msk.bf16.vlgmr.msra.gmra.mxu3 %vm64_vm0, %v2029_v45 }
 0x354   :  { %1576 = vmatmul.msk.bf16.vlgmr.msrb.gmra.mxu0 %vm64_vm0, %v2023_v30 }
 0x364   :  { %1577 = vmatmul.msk.bf16.gmra.mxu0 %vm64_vm0, %v2034_v49 }
 0x3bd   :  { %v419_v60 = vpop.f32.mrf.mxu3 }
 0x3c1   :  { %v441_v61 = vpop.f32.mrf.mxu0 }
 0x3c2   :  { %v445_v62 = vpack.c.bf16 %v441_v61, %v419_v60 }
 0x3c4   :  { %1541 = vmatmul.msk.bf16.vlgmr.msrb.gmra.mxu1 %vm332_vm15, %v445_v62 }
 0x3c5   :  { %v421_v63 = vpop.f32.mrf.mxu3  ;;  %771 = vmatpush.bf16.msrb.mxu1 %v1724_v1 }
 0x3c9   :  { %v443_v0 = vpop.f32.mrf.mxu0  ;;  %772 = vmatpush.bf16.msrb.mxu1 %v1723_v2  ;;  %v1726_v2 = vld [vmem:[%s2280_s7 + $0x28] sm:$0xff] }
 0x3cd   :  { %v519_v10 = vpop.f32.mrf.mxu3 }
 0x3ce   :  { %v524_v13 = vmul.f32 0.35355338, %v519_v10 }
 0x3d0   :  { %v526_v15 = vpack.c.bf16 %v524_v13, %v524_v13 }
 0x3d1   :  { %v554_v3 = vpop.f32.mrf.mxu0 }
 0x3d2   :  { %v564_v4 = vpack.c.bf16 %v554_v3, %v554_v3  ;;  %v1725_v3 = vld [vmem:[%s2280_s7 + $0x20] sm:$0xff] }
 0x3d4   :  { %1590 = vmatmul.msk.bf16.vlgmr.msra.gmra.mxu1 %vm64_vm0, %v2023_v30  ;;  %v610_v7 = vunpack.c.l.b16 %v564_v4  ;;  %v1728_v4 = vld [vmem:[%s2281_s8 + $0x28] sm:$0xff] }
 0x3d5   :  { %v521_v23 = vpop.f32.mrf.mxu3 }
 0x3d6   :  { %v525_v25 = vmul.f32 0.35355338, %v521_v23 }
 0x3d8   :  { %v527_v26 = vpack.c.bf16 %v525_v25, %v525_v25 }
 0x3d9   :  { %v556_v5 = vpop.f32.mrf.mxu0 }
 0x3da   :  { %v565_v6 = vpack.c.bf16 %v556_v5, %v556_v5  ;;  %v1727_v5 = vld [vmem:[%s2281_s8 + $0x20] sm:$0xff] }
 0x3dc   :  { %v611_v8 = vunpack.c.l.b16 %v565_v6 }
 0x3de   :  { %v612_v9 = vpack.c.b16 %v611_v8, %v610_v7 }
 0x3e0   :  { %v617_v11 = vsel %vm332_vm15, %v612_v9, 0 }
 0x3e1   :  { %v559_v12 = vpop.f32.mrf.mxu0  ;;  %626 = vmatpush.bf16.xpose.msra.mxu2 %v617_v11 }
 0x3e2   :  { %v566_v16 = vpack.c.bf16 %v559_v12, %v559_v12 }
 0x3e4   :  { %1591 = vmatmul.msk.bf16.gmra.mxu1 %vm64_vm0, %v2034_v49  ;;  %v634_v20 = vunpack.c.l.b16 %v566_v16  ;;  %v1729_v16 = vld [vmem:[%s2279_s6 + $0x30] sm:$0xff] }
 0x3e8   :  { %1592 = vmatmul.msk.bf16.vlgmr.msra.gmra.mxu2 %vm332_vm15, %v526_v15  ;;  %v1730_v15 = vld [vmem:[%s2279_s6 + $0x38] sm:$0xff] }
 0x3e9   :  { %v561_v17 = vpop.f32.mrf.mxu0 }
 0x3ea   :  { %v567_v18 = vpack.c.bf16 %v561_v17, %v561_v17  ;;  %v725_v17 = vld [vmem:[%s2282_s9 + $0x4] sm:$0xf] }
 0x3ec   :  { %v635_v21 = vunpack.c.l.b16 %v567_v18  ;;  %v730_v18 = vsel %vm192_vm14, %v725_v17, 0 }
 0x3ed   :  { %739 = vmatpush.bf16.msra.mxu0 %v730_v18 }
 0x3ee   :  { %v636_v22 = vpack.c.b16 %v635_v21, %v634_v20 }
 0x3f0   :  { %v641_v24 = vsel %vm332_vm15, %v636_v22, 0 }
 0x3f1   :  { %650 = vmatpush.bf16.xpose.msrb.mxu3 %v641_v24 }
 0x3f4   :  { %1609 = vmatmul.msk.bf16.vlgmr.msrb.gmra.mxu1 %vm64_vm0, %v2029_v45 }
 0x3f8   :  { %1593 = vmatmul.msk.bf16.vlgmr.msrb.gmra.mxu3 %vm332_vm15, %v527_v26 }
 0x441   :  { %v2099_v28 = vpop.f32.mrf.mxu1 }
 0x449   :  { %v464_v32 = vpop.f32.mrf.mxu1 }
 0x44a   :  { %v2101_v33 = vadd.f32 %v490_v31, %v464_v32 }
 0x451   :  { %v594_v34 = vpop.f32.mrf.mxu1 }
 0x452   :  { %v604_v35 = vpack.c.bf16 %v594_v34, %v594_v34 }
 0x454   :  { %v682_v40 = vunpack.c.l.b16 %v604_v35 }
 0x459   :  { %v596_v36 = vpop.f32.mrf.mxu1 }
 0x45a   :  { %v605_v37 = vpack.c.bf16 %v596_v36, %v596_v36 }
 0x45c   :  { %v683_v41 = vunpack.c.l.b16 %v605_v37 }
 0x45e   :  { %v684_v42 = vpack.c.b16 %v683_v41, %v682_v40 }
 0x460   :  { %696 = vmatpush.bf16.msrb.mxu2 %v684_v42 }
 0x461   :  { %v599_v29 = vpop.f32.mrf.mxu1 }
 0x462   :  { %v606_v43 = vpack.c.bf16 %v599_v29, %v599_v29 }
 0x464   :  { %v704_v47 = vunpack.c.l.b16 %v606_v43  ;;  %806 = vmatpush.bf16.msra.mxu2 %v1726_v2 }
 0x468   :  { %807 = vmatpush.bf16.msra.mxu2 %v1725_v3  ;;  %v489_v3 = vadd.f32 %v2097_v27, %v2099_v28 }
 0x469   :  { %v601_v44 = vpop.f32.mrf.mxu1 }
 0x46a   :  { %v607_v19 = vpack.c.bf16 %v601_v44, %v601_v44 }
 0x46b   :  { %v628_v46 = vpop.f32.mrf.mxu2 }
 0x46c   :  { %v705_v48 = vunpack.c.l.b16 %v607_v19  ;;  %v656_v50 = vsel %vm376_vm1, %v628_v46, -inf }
 0x46d   :  { %657 = vmax.xlane.f32.xlu0 %v656_v50 }
 0x46e   :  { %v706_v51 = vpack.c.b16 %v705_v48, %v704_v47 }
 0x470   :  { %718 = vmatpush.bf16.msra.mxu3 %v706_v51 }
 0x471   :  { %v774_v36 = vpop.f32.mrf.mxu1 }
 0x472   :  { %v779_v42 = vmul.f32 0.35355338, %v774_v36 }
 0x473   :  { %v630_v52 = vpop.f32.mrf.mxu2 }
 0x474   :  { %846 = vmatpush.bf16.msrb.mxu3 %v1728_v4  ;;  %v781_v29 = vpack.c.bf16 %v779_v42, %v779_v42 }
 0x478   :  { %847 = vmatpush.bf16.msrb.mxu3 %v1727_v5 }
 0x47b   :  { %v652_v53 = vpop.f32.mrf.mxu3 }
 0x47c   :  { %v659_v54 = vsel %vm376_vm1, %v652_v53, -inf }
 0x47d   :  { %660 = vmax.xlane.f32.xlu1 %v659_v54 }
 0x483   :  { %v654_v55 = vpop.f32.mrf.mxu3 }
 0x4e0   :  { %v658_v56 = vpop.xlane.xlu0 %657 }
 0x4e1   :  { %v662_v57 = vsub.f32 %v628_v46, %v658_v56  ;;  %v776_v56 = vpop.f32.mrf.mxu1 }
 0x4e3   :  { %v664_v58 = vmul.f32 1.442695, %v662_v57 }
 0x4e5   :  { %1770 = vpow2.f32 %v664_v58 }
 0x4eb   :  { %v1771_v59 = vpop.eup %1770 }
 0x4ec   :  { %v668_v60 = vsel %vm376_vm1, %v1771_v59, 0.0 }
 0x4ed   :  { %669 = vadd.xlane.f32.xlu2 %v668_v60 }
 0x4f0   :  { %v661_v61 = vpop.xlane.xlu1 %660 }
 0x4f1   :  { %v663_v62 = vsub.f32 %v652_v53, %v661_v61 }
 0x4f3   :  { %v666_v63 = vmul.f32 1.442695, %v663_v62 }
 0x4f5   :  { %1772 = vpow2.f32 %v666_v63 }
 0x4fb   :  { %v1773_v0 = vpop.eup %1772 }
 0x4fc   :  { %v671_v1 = vsel %vm376_vm1, %v1773_v0, 0.0 }
 0x4fd   :  { %672 = vadd.xlane.f32.xlu0 %v671_v1 }
 0x560   :  { %v670_v6 = vpop.xlane.xlu2 %669 }
 0x561   :  { %1774 = vrcp.f32 %v670_v6 }
 0x567   :  { %v1775_v7 = vpop.eup %1774 }
 0x568   :  { %v676_v8 = vmul.f32 %v1775_v7, %v1771_v59  ;;  %v780_v59 = vmul.f32 0.35355338, %v776_v56 }
 0x56a   :  { %v678_v9 = vpack.c.bf16 %v676_v8, %v676_v8  ;;  %v782_v60 = vpack.c.bf16 %v780_v59, %v780_v59 }
 0x56c   :  { %1594 = vmatmul.msk.bf16.vlgmr.msrb.gmra.mxu2 %vm376_vm1, %v678_v9 }
 0x570   :  { %v673_v10 = vpop.xlane.xlu0 %672 }
 0x571   :  { %1776 = vrcp.f32 %v673_v10 }
 0x577   :  { %v1777_v11 = vpop.eup %1776 }
 0x578   :  { %v677_v12 = vmul.f32 %v1777_v11, %v1773_v0 }
 0x57a   :  { %v679_v13 = vpack.c.bf16 %v677_v12, %v677_v12 }
 0x57c   :  { %1595 = vmatmul.msk.bf16.vlgmr.msra.gmra.mxu3 %vm376_vm1, %v679_v13  ;;  %1622 = vmatmul.msk.bf16.vlgmr.msra.gmra.mxu2 %vm64_vm0, %v2023_v30 }
 0x57d   :  { %1026 = vmatpush.bf16.msra.mxu3 %v1730_v15 }
 0x581   :  { %1027 = vmatpush.bf16.msra.mxu3 %v1729_v16 }
 0x58c   :  { %1623 = vmatmul.msk.bf16.gmra.mxu2 %vm64_vm0, %v2034_v49  ;;  %1636 = vmatmul.msk.bf16.vlgmr.msrb.gmra.mxu3 %vm64_vm0, %v2023_v30 }
 0x59c   :  { %1637 = vmatmul.msk.bf16.gmra.mxu3 %vm64_vm0, %v2034_v49 }
 0x5ac   :  { %1655 = vmatmul.msk.bf16.vlgmr.msra.gmra.mxu3 %vm64_vm0, %v2029_v45 }
 0x5ef   :  { %v698_v20 = vpop.f32.mrf.mxu2 }
 0x5f7   :  { %v700_v21 = vpop.f32.mrf.mxu2 }
 0x5ff   :  { %v720_v22 = vpop.f32.mrf.mxu3  ;;  %v809_v23 = vpop.f32.mrf.mxu2 }
 0x600   :  { %v724_v24 = vpack.c.bf16 %v720_v22, %v698_v20  ;;  %v819_v25 = vpack.c.bf16 %v809_v23, %v809_v23  ;;  %v1732_v23 = vld [vmem:[%s2280_s7 + $0x38] sm:$0xff] }
 0x602   :  { %1596 = vmatmul.msk.bf16.vlgmr.msra.gmra.mxu0 %vm332_vm15, %v724_v24  ;;  %v865_v34 = vunpack.c.l.b16 %v819_v25  ;;  %v1731_v24 = vld [vmem:[%s2280_s7 + $0x30] sm:$0xff]  ;;  %v1734_v25 = vld [vmem:[%s2281_s8 + $0x38] sm:$0xff] }
 0x607   :  { %v722_v26 = vpop.f32.mrf.mxu3  ;;  %v811_v31 = vpop.f32.mrf.mxu2 }
 0x608   :  { %v820_v32 = vpack.c.bf16 %v811_v31, %v811_v31  ;;  %v1733_v26 = vld [vmem:[%s2281_s8 + $0x30] sm:$0xff] }
 0x60a   :  { %v866_v45 = vunpack.c.l.b16 %v820_v32 }
 0x60c   :  { %v867_v35 = vpack.c.b16 %v866_v45, %v865_v34 }
 0x60e   :  { %v872_v37 = vsel %vm332_vm15, %v867_v35, 0 }
 0x60f   :  { %v814_v40 = vpop.f32.mrf.mxu2  ;;  %v849_v41 = vpop.f32.mrf.mxu3  ;;  %881 = vmatpush.bf16.xpose.msrb.mxu0 %v872_v37 }
 0x610   :  { %v821_v43 = vpack.c.bf16 %v814_v40, %v814_v40  ;;  %v859_v44 = vpack.c.bf16 %v849_v41, %v849_v41  ;;  %v980_v41 = vld [vmem:[%s2282_s9 + $0x8] sm:$0xf] }
 0x611   :  { %v985_v42 = vsel %vm192_vm14, %v980_v41, 0 }
 0x612   :  { %v889_v50 = vunpack.c.l.b16 %v821_v43  ;;  %v937_v51 = vunpack.c.l.b16 %v859_v44  ;;  %994 = vmatpush.bf16.msrb.mxu2 %v985_v42 }
 0x616   :  { %1638 = vmatmul.msk.bf16.vlgmr.msrb.gmra.mxu0 %vm332_vm15, %v781_v29 }
 0x617   :  { %v816_v19 = vpop.f32.mrf.mxu2  ;;  %v851_v46 = vpop.f32.mrf.mxu3 }
 0x618   :  { %v822_v47 = vpack.c.bf16 %v816_v19, %v816_v19  ;;  %v860_v48 = vpack.c.bf16 %v851_v46, %v851_v46 }
 0x61a   :  { %v890_v52 = vunpack.c.l.b16 %v822_v47  ;;  %v938_v53 = vunpack.c.l.b16 %v860_v48 }
 0x61c   :  { %v891_v54 = vpack.c.b16 %v890_v52, %v889_v50  ;;  %v939_v55 = vpack.c.b16 %v938_v53, %v937_v51 }
 0x61e   :  { %951 = vmatpush.bf16.msra.mxu0 %v939_v55  ;;  %v896_v57 = vsel %vm332_vm15, %v891_v54, 0 }
 0x61f   :  { %v854_v58 = vpop.f32.mrf.mxu3  ;;  %905 = vmatpush.bf16.xpose.msra.mxu1 %v896_v57 }
 0x620   :  { %v861_v61 = vpack.c.bf16 %v854_v58, %v854_v58 }
 0x622   :  { %v959_v0 = vunpack.c.l.b16 %v861_v61  ;;  %1061 = vmatpush.bf16.msrb.mxu0 %v1732_v23 }
 0x626   :  { %1639 = vmatmul.msk.bf16.vlgmr.msra.gmra.mxu1 %vm332_vm15, %v782_v60  ;;  %1062 = vmatpush.bf16.msrb.mxu0 %v1731_v24 }
 0x627   :  { %v856_v62 = vpop.f32.mrf.mxu3 }
 0x628   :  { %v862_v63 = vpack.c.bf16 %v856_v62, %v856_v62 }
 0x62a   :  { %v960_v1 = vunpack.c.l.b16 %v862_v63 }
 0x62c   :  { %v961_v2 = vpack.c.b16 %v960_v1, %v959_v0 }
 0x62e   :  { %973 = vmatpush.bf16.msrb.mxu1 %v961_v2 }
 0x62f   :  { %v1029_v53 = vpop.f32.mrf.mxu3 }
 0x630   :  { %v1034_v57 = vmul.f32 0.35355338, %v1029_v53 }
 0x632   :  { %1101 = vmatpush.bf16.msra.mxu1 %v1734_v25  ;;  %v1036_v58 = vpack.c.bf16 %v1034_v57, %v1034_v57 }
 0x636   :  { %1102 = vmatpush.bf16.msra.mxu1 %v1733_v26 }
 0x67f   :  { %v741_v4 = vpop.f32.mrf.mxu0 }
 0x680   :  { %v2148_v5 = vadd.f32 %v741_v4, %v489_v3 }
 0x687   :  { %v743_v6 = vpop.f32.mrf.mxu0 }
 0x688   :  { %v2151_v7 = vadd.f32 %v743_v6, %v2101_v33 }
 0x693   :  { %v883_v8 = vpop.f32.mrf.mxu0 }
 0x694   :  { %v911_v9 = vsel %vm376_vm1, %v883_v8, -inf }
 0x695   :  { %912 = vmax.xlane.f32.xlu1 %v911_v9  ;;  %v1031_v9 = vpop.f32.mrf.mxu3 }
 0x69b   :  { %v885_v10 = vpop.f32.mrf.mxu0 }
 0x6a3   :  { %v907_v11 = vpop.f32.mrf.mxu1 }
 0x6a4   :  { %v914_v12 = vsel %vm376_vm1, %v907_v11, -inf }
 0x6a5   :  { %915 = vmax.xlane.f32.xlu2 %v914_v12  ;;  %v1035_v12 = vmul.f32 0.35355338, %v1031_v9 }
 0x6ab   :  { %v909_v13 = vpop.f32.mrf.mxu1 }
 0x6ac   :  { %v1037_v13 = vpack.c.bf16 %v1035_v12, %v1035_v12 }
 0x708   :  { %v913_v15 = vpop.xlane.xlu1 %912 }
 0x709   :  { %v917_v16 = vsub.f32 %v883_v8, %v913_v15 }
 0x70b   :  { %v919_v27 = vmul.f32 1.442695, %v917_v16 }
 0x70d   :  { %1778 = vpow2.f32 %v919_v27 }
 0x713   :  { %v1779_v28 = vpop.eup %1778 }
 0x714   :  { %v923_v17 = vsel %vm376_vm1, %v1779_v28, 0.0 }
 0x715   :  { %924 = vadd.xlane.f32.xlu0 %v923_v17 }
 0x718   :  { %v916_v33 = vpop.xlane.xlu2 %915 }
 0x719   :  { %v918_v18 = vsub.f32 %v907_v11, %v916_v33 }
 0x71b   :  { %v921_v20 = vmul.f32 1.442695, %v918_v18 }
 0x71d   :  { %1780 = vpow2.f32 %v921_v20 }
 0x723   :  { %v1781_v21 = vpop.eup %1780 }
 0x724   :  { %v926_v22 = vsel %vm376_vm1, %v1781_v21, 0.0 }
 0x725   :  { %927 = vadd.xlane.f32.xlu1 %v926_v22 }
 0x788   :  { %v925_v31 = vpop.xlane.xlu0 %924 }
 0x789   :  { %1782 = vrcp.f32 %v925_v31 }
 0x78f   :  { %v1783_v32 = vpop.eup %1782 }
 0x790   :  { %v931_v34 = vmul.f32 %v1783_v32, %v1779_v28 }
 0x792   :  { %v933_v45 = vpack.c.bf16 %v931_v34, %v931_v34 }
 0x794   :  { %1640 = vmatmul.msk.bf16.vlgmr.msra.gmra.mxu0 %vm376_vm1, %v933_v45 }
 0x798   :  { %v928_v35 = vpop.xlane.xlu1 %927 }
 0x799   :  { %1784 = vrcp.f32 %v928_v35 }
 0x79f   :  { %v1785_v36 = vpop.eup %1784 }
 0x7a0   :  { %v932_v37 = vmul.f32 %v1785_v36, %v1781_v21 }
 0x7a2   :  { %v934_v40 = vpack.c.bf16 %v932_v37, %v932_v37 }
 0x7a4   :  { %1641 = vmatmul.msk.bf16.vlgmr.msrb.gmra.mxu1 %vm376_vm1, %v934_v40  ;;  %1668 = vmatmul.msk.bf16.vlgmr.msrb.gmra.mxu0 %vm64_vm0, %v2023_v30 }
 0x7b4   :  { %1669 = vmatmul.msk.bf16.gmra.mxu0 %vm64_vm0, %v2034_v49  ;;  %1682 = vmatmul.msk.bf16.vlgmr.msra.gmra.mxu1 %vm64_vm0, %v2023_v30 }
 0x7c4   :  { %1683 = vmatmul.msk.bf16.gmra.mxu1 %vm64_vm0, %v2034_v49 }
 0x811   :  { %v953_v29 = vpop.f32.mrf.mxu0 }
 0x819   :  { %v955_v43 = vpop.f32.mrf.mxu0 }
 0x821   :  { %v975_v44 = vpop.f32.mrf.mxu1  ;;  %v1064_v19 = vpop.f32.mrf.mxu0 }
 0x822   :  { %v979_v46 = vpack.c.bf16 %v975_v44, %v953_v29  ;;  %v1074_v47 = vpack.c.bf16 %v1064_v19, %v1064_v19  ;;  %v1235_v29 = vld [vmem:[%s2282_s9 + $0xc] sm:$0xf] }
 0x823   :  { %v1240_v43 = vsel %vm192_vm14, %v1235_v29, 0 }
 0x824   :  { %1642 = vmatmul.msk.bf16.vlgmr.msrb.gmra.mxu2 %vm332_vm15, %v979_v46  ;;  %v1120_v51 = vunpack.c.l.b16 %v1074_v47  ;;  %1249 = vmatpush.bf16.msra.mxu0 %v1240_v43 }
 0x829   :  { %v977_v48 = vpop.f32.mrf.mxu1  ;;  %v1066_v30 = vpop.f32.mrf.mxu0 }
 0x82a   :  { %v1075_v50 = vpack.c.bf16 %v1066_v30, %v1066_v30 }
 0x82c   :  { %v1121_v49 = vunpack.c.l.b16 %v1075_v50 }
 0x82e   :  { %v1122_v52 = vpack.c.b16 %v1121_v49, %v1120_v51 }
 0x830   :  { %v1127_v54 = vsel %vm332_vm15, %v1122_v52, 0 }
 0x831   :  { %v1069_v55 = vpop.f32.mrf.mxu0  ;;  %v1104_v56 = vpop.f32.mrf.mxu1  ;;  %1136 = vmatpush.bf16.xpose.msra.mxu2 %v1127_v54 }
 0x832   :  { %v1076_v59 = vpack.c.bf16 %v1069_v55, %v1069_v55  ;;  %v1114_v60 = vpack.c.bf16 %v1104_v56, %v1104_v56  ;;  %v1747_v56 = vld [vmem:[%s2283_s10] ss:$0 sm:$0xff] }
 0x834   :  { %v1144_v1 = vunpack.c.l.b16 %v1076_v59  ;;  %v1192_v2 = vunpack.c.l.b16 %v1114_v60 }
 0x838   :  { %1684 = vmatmul.msk.bf16.vlgmr.msra.gmra.mxu2 %vm332_vm15, %v1036_v58 }
 0x839   :  { %v1071_v61 = vpop.f32.mrf.mxu0  ;;  %v1106_v62 = vpop.f32.mrf.mxu1 }
 0x83a   :  { %v1077_v63 = vpack.c.bf16 %v1071_v61, %v1071_v61  ;;  %v1115_v0 = vpack.c.bf16 %v1106_v62, %v1106_v62 }
 0x83c   :  { %v1145_v3 = vunpack.c.l.b16 %v1077_v63  ;;  %v1193_v4 = vunpack.c.l.b16 %v1115_v0 }
 0x83e   :  { %v1146_v6 = vpack.c.b16 %v1145_v3, %v1144_v1  ;;  %v1194_v8 = vpack.c.b16 %v1193_v4, %v1192_v2 }
 0x840   :  { %1206 = vmatpush.bf16.msrb.mxu2 %v1194_v8  ;;  %v1151_v10 = vsel %vm332_vm15, %v1146_v6, 0 }
 0x841   :  { %v1109_v11 = vpop.f32.mrf.mxu1  ;;  %1160 = vmatpush.bf16.xpose.msrb.mxu3 %v1151_v10 }
 0x842   :  { %v1116_v15 = vpack.c.bf16 %v1109_v11, %v1109_v11 }
 0x844   :  { %v1214_v28 = vunpack.c.l.b16 %v1116_v15 }
 0x848   :  { %1685 = vmatmul.msk.bf16.vlgmr.msrb.gmra.mxu3 %vm332_vm15, %v1037_v13  ;;  %v1736_v13 = vld [vmem:[%s2286_s13 + $0x8] sm:$0xff] }
 0x849   :  { %v1111_v16 = vpop.f32.mrf.mxu1  ;;  %1352 = vmatpush.bf16.msrb.mxu1 %v1736_v13 }
 0x84a   :  { %v1117_v27 = vpack.c.bf16 %v1111_v16, %v1111_v16 }
 0x84c   :  { %v1215_v17 = vunpack.c.l.b16 %v1117_v27  ;;  %v1735_v27 = vld [vmem:[%s2286_s13] sm:$0xff] }
 0x84d   :  { %1353 = vmatpush.bf16.msrb.mxu1 %v1735_v27 }
 0x84e   :  { %v1216_v33 = vpack.c.b16 %v1215_v17, %v1214_v28 }
 0x850   :  { %1228 = vmatpush.bf16.msra.mxu3 %v1216_v33 }
 0x8a7   :  { %v996_v18 = vpop.f32.mrf.mxu2 }
 0x8a8   :  { %v1001_v20 = vadd.f32 %v996_v18, %v2148_v5 }
 0x8af   :  { %v998_v21 = vpop.f32.mrf.mxu2 }
 0x8b0   :  { %v1002_v22 = vadd.f32 %v998_v21, %v2151_v7 }
 0x8bb   :  { %v1138_v23 = vpop.f32.mrf.mxu2 }
 0x8bc   :  { %v1166_v24 = vsel %vm376_vm1, %v1138_v23, -inf }
 0x8bd   :  { %1167 = vmax.xlane.f32.xlu2 %v1166_v24 }
 0x8c3   :  { %v1140_v25 = vpop.f32.mrf.mxu2 }
 0x8cb   :  { %v1162_v26 = vpop.f32.mrf.mxu3 }
 0x8cc   :  { %v1169_v31 = vsel %vm376_vm1, %v1162_v26, -inf }
 0x8cd   :  { %1170 = vmax.xlane.f32.xlu0 %v1169_v31 }
 0x8d3   :  { %v1164_v32 = vpop.f32.mrf.mxu3 }
 0x930   :  { %v1168_v34 = vpop.xlane.xlu2 %1167 }
 0x931   :  { %v1172_v45 = vsub.f32 %v1138_v23, %v1168_v34 }
 0x933   :  { %v1174_v35 = vmul.f32 1.442695, %v1172_v45 }
 0x935   :  { %1786 = vpow2.f32 %v1174_v35 }
 0x93b   :  { %v1787_v36 = vpop.eup %1786 }
 0x93c   :  { %v1178_v5 = vsel %vm376_vm1, %v1787_v36, 0.0 }
 0x93d   :  { %1179 = vadd.xlane.f32.xlu1 %v1178_v5 }
 0x940   :  { %v1171_v37 = vpop.xlane.xlu0 %1170 }
 0x941   :  { %v1173_v7 = vsub.f32 %v1162_v26, %v1171_v37 }
 0x943   :  { %v1176_v40 = vmul.f32 1.442695, %v1173_v7  ;;  %v1749_v7 = vld [vmem:[%s2285_s12] ss:$0 sm:$0xff] }
 0x945   :  { %1788 = vpow2.f32 %v1176_v40 }
 0x94b   :  { %v1789_v41 = vpop.eup %1788 }
 0x94c   :  { %v1181_v42 = vsel %vm376_vm1, %v1789_v41, 0.0 }
 0x94d   :  { %1182 = vadd.xlane.f32.xlu2 %v1181_v42 }
 0x9b0   :  { %v1180_v44 = vpop.xlane.xlu1 %1179 }
 0x9b1   :  { %1790 = vrcp.f32 %v1180_v44 }
 0x9b7   :  { %v1791_v19 = vpop.eup %1790 }
 0x9b8   :  { %v1186_v46 = vmul.f32 %v1791_v19, %v1787_v36  ;;  %v1750_v19 = vld [vmem:[%s2287_s14] ss:$0 sm:$0xff] }
 0x9ba   :  { %v1188_v47 = vpack.c.bf16 %v1186_v46, %v1186_v46 }
 0x9bc   :  { %1686 = vmatmul.msk.bf16.vlgmr.msrb.gmra.mxu2 %vm376_vm1, %v1188_v47 }
 0x9c0   :  { %v1183_v48 = vpop.xlane.xlu2 %1182 }
 0x9c1   :  { %1792 = vrcp.f32 %v1183_v48 }
 0x9c7   :  { %v1793_v30 = vpop.eup %1792 }
 0x9c8   :  { %v1187_v50 = vmul.f32 %v1793_v30, %v1789_v41 }
 0x9ca   :  { %v1189_v51 = vpack.c.bf16 %v1187_v50, %v1187_v50 }
 0x9cc   :  { %1687 = vmatmul.msk.bf16.vlgmr.msra.gmra.mxu3 %vm376_vm1, %v1189_v51 }
 0xa3f   :  { %v1208_v49 = vpop.f32.mrf.mxu2 }
 0xa47   :  { %v1210_v52 = vpop.f32.mrf.mxu2 }
 0xa4f   :  { %v1230_v53 = vpop.f32.mrf.mxu3 }
 0xa50   :  { %v1234_v54 = vpack.c.bf16 %v1230_v53, %v1208_v49 }
 0xa52   :  { %1688 = vmatmul.msk.bf16.vlgmr.msra.gmra.mxu0 %vm332_vm15, %v1234_v54 }
 0xa57   :  { %v1232_v55 = vpop.f32.mrf.mxu3 }
 0xacf   :  { %v1251_v57 = vpop.f32.mrf.mxu0 }
 0xad0   :  { %v1256_v58 = vadd.f32 %v1251_v57, %v1001_v20 }
 0xad2   :  { %v1262_v59 = vadd.f32 %v1747_v56, %v1256_v58 }
 0xad4   :  { %v2205_v60 = vadd.f32 %v1262_v59, %v2016_v39 }
 0xad6   :  { %v1268_v61 = vsel %vm64_vm0, %v2205_v60, 0.0 }
 0xad7   :  { %1269 = vadd.xlane.f32.xlu0 %v1268_v61  ;;  %v1253_v62 = vpop.f32.mrf.mxu0 }
 0xad8   :  { %v1257_v63 = vadd.f32 %v1253_v62, %v1002_v22 }
 0xada   :  { %v1263_v0 = vadd.f32 %v1747_v56, %v1257_v63 }
 0xadc   :  { %v2210_v1 = vadd.f32 %v1263_v0, %v2014_v38 }
 0xade   :  { %v1271_v2 = vsel %vm64_vm0, %v2210_v1, 0.0 }
 0xadf   :  { %1272 = vadd.xlane.f32.xlu1 %v1271_v2 }
 0xb4a   :  { %v1270_v3 = vpop.xlane.xlu0 %1269 }
 0xb4b   :  { %v1274_v4 = vmul.f32 %v1270_v3, %v1938_v14 }
 0xb4d   :  { %v1276_v39 = vsub.f32 %v2205_v60, %v1274_v4 }
 0xb4f   :  { %v1278_v6 = vmul.f32 %v1276_v39, %v1276_v39 }
 0xb51   :  { %v1280_v8 = vsel %vm64_vm0, %v1278_v6, 0.0 }
 0xb52   :  { %1281 = vadd.xlane.f32.xlu2 %v1280_v8  ;;  %v1273_v9 = vpop.xlane.xlu1 %1272 }
 0xb53   :  { %v1275_v10 = vmul.f32 %v1273_v9, %v1938_v14 }
 0xb55   :  { %v1277_v11 = vsub.f32 %v2210_v1, %v1275_v10 }
 0xb57   :  { %v1279_v38 = vmul.f32 %v1277_v11, %v1277_v11 }
 0xb59   :  { %v1283_v12 = vsel %vm64_vm0, %v1279_v38, 0.0 }
 0xb5a   :  { %1284 = vadd.xlane.f32.xlu0 %v1283_v12 }
 0xbc5   :  { %v1282_v15 = vpop.xlane.xlu2 %1281 }
 0xbc6   :  { %v1286_v16 = vmul.f32 %v1282_v15, %v1938_v14 }
 0xbc8   :  { %v1288_v28 = vadd.f32 1e-05, %v1286_v16  ;;  %v1738_v16 = vld [vmem:[%s2288_s15 + $0x8] sm:$0xff] }
 0xbc9   :  { %1478 = vmatpush.bf16.msra.mxu2 %v1738_v16 }
 0xbca   :  { %1794 = vrsqrt.f32 %v1288_v28  ;;  %vm1296_vm3 = vweird.f32 %v1288_v28 }
 0xbcd   :  { %v1285_v17 = vpop.xlane.xlu0 %1284 }
 0xbce   :  { %v1287_v33 = vmul.f32 %v1285_v17, %v1938_v14  ;;  %v1748_v14 = vld [vmem:[%s2284_s11] ss:$0 sm:$0xff] }
 0xbd0   :  { %v1795_v18 = vpop.eup %1794  ;;  %v1289_v20 = vadd.f32 1e-05, %v1287_v33 }
 0xbd1   :  { %v1291_v21 = vmul.f32 %v1795_v18, %v1288_v28  ;;  %vm1297_vm2 = vweird.f32 %v1795_v18 }
 0xbd2   :  { %1796 = vrsqrt.f32 %v1289_v20  ;;  %vm1298_vm4 = vmor %vm1296_vm3, %vm1297_vm2  ;;  %vm1306_vm6 = vweird.f32 %v1289_v20 }
 0xbd3   :  { %v1292_v22 = vmul.f32 %v1795_v18, %v1291_v21 }
 0xbd5   :  { %v1293_v23 = vmul.f32 0.5, %v1292_v22 }
 0xbd7   :  { %v1294_v24 = vsub.f32 1.5, %v1293_v23 }
 0xbd8   :  { %v1797_v25 = vpop.eup %1796 }
 0xbd9   :  { %v1295_v26 = vmul.f32 %v1795_v18, %v1294_v24  ;;  %v1301_v31 = vmul.f32 %v1797_v25, %v1289_v20  ;;  %vm1307_vm5 = vweird.f32 %v1797_v25  ;;  %v1737_v20 = vld [vmem:[%s2288_s15] sm:$0xff] }
 0xbda   :  { %vm1308_vm7 = vmor %vm1306_vm6, %vm1307_vm5  ;;  %1479 = vmatpush.bf16.msra.mxu2 %v1737_v20 }
 0xbdb   :  { %v1302_v32 = vmul.f32 %v1797_v25, %v1301_v31  ;;  %v1299_v34 = vsel %vm1298_vm4, %v1795_v18, %v1295_v26 }
 0xbdc   :  { %v1310_v36 = vmul.f32 %v1299_v34, %v1276_v39 }
 0xbdd   :  { %v1303_v45 = vmul.f32 0.5, %v1302_v32 }
 0xbde   :  { %v1315_v40 = vmul.f32 %v1748_v14, %v1310_v36 }
 0xbdf   :  { %v1304_v35 = vsub.f32 1.5, %v1303_v45 }
 0xbe0   :  { %v1320_v29 = vadd.f32 %v1749_v7, %v1315_v40 }
 0xbe1   :  { %v1305_v5 = vmul.f32 %v1797_v25, %v1304_v35 }
 0xbe3   :  { %v1309_v37 = vsel %vm1308_vm7, %v1797_v25, %v1305_v5 }
 0xbe4   :  { %v1311_v41 = vmul.f32 %v1309_v37, %v1277_v11 }
 0xbe6   :  { %v1316_v42 = vmul.f32 %v1748_v14, %v1311_v41 }
 0xbe8   :  { %v1321_v43 = vadd.f32 %v1749_v7, %v1316_v42 }
 0xbea   :  { %v1322_v44 = vpack.c.bf16 %v1321_v43, %v1320_v29 }
 0xbec   :  { %1697 = vmatmul.msk.bf16.vlgmr.msrb.gmra.mxu1 %vm64_vm0, %v1322_v44 }
 0xc69   :  { %v1355_v46 = vpop.f32.mrf.mxu1 }
 0xc6a   :  { %v2238_v47 = vadd.f32 %v1750_v19, %v1355_v46 }
 0xc6c   :  { %v2241_v48 = vmul.f32 0.70710677, %v2238_v47 }
 0xc6e   :  { %v1364_v30 = vmul.f32 %v2241_v48, %v2241_v48 }
 0xc70   :  { %v1365_v50 = vmin.f32 %v1364_v30, 16.0 }
 0xc71   :  { %v1357_v51 = vpop.f32.mrf.mxu1 }
 0xc72   :  { %v1366_v49 = vmul.f32 2.1237322e-06, %v1365_v50  ;;  %v1377_v52 = vmul.f32 3.8918573e-05, %v1365_v50  ;;  %v2245_v53 = vadd.f32 %v1750_v19, %v1357_v51 }
 0xc74   :  { %v1367_v54 = vadd.f32 0.00028619796, %v1366_v49  ;;  %v1378_v55 = vadd.f32 0.001143296, %v1377_v52  ;;  %v2248_v56 = vmul.f32 0.70710677, %v2245_v53 }
 0xc76   :  { %v1379_v57 = vmul.f32 %v1378_v55, %v1365_v50  ;;  %v1404_v58 = vmul.f32 %v2248_v56, %v2248_v56  ;;  %v1368_v59 = vmul.f32 %v1367_v54, %v1365_v50 }
 0xc78   :  { %v1380_v61 = vadd.f32 0.014752088, %v1379_v57  ;;  %v1405_v62 = vmin.f32 %v1404_v58, 16.0  ;;  %v1369_v3 = vadd.f32 0.0036580483, %v1368_v59 }
 0xc7a   :  { %v1381_v63 = vmul.f32 %v1380_v61, %v1365_v50  ;;  %v1406_v0 = vmul.f32 2.1237322e-06, %v1405_v62  ;;  %v1417_v2 = vmul.f32 3.8918573e-05, %v1405_v62  ;;  %v1370_v11 = vmul.f32 %v1369_v3, %v1365_v50 }
 0xc7b   :  { %v1360_v3 = vmul.f32 0.5, %v2238_v47 }
 0xc7c   :  { %v1382_v4 = vadd.f32 0.112945676, %v1381_v63  ;;  %v1407_v39 = vadd.f32 0.00028619796, %v1406_v0  ;;  %v1418_v6 = vadd.f32 0.001143296, %v1417_v2 }
 0xc7d   :  { %v1371_v28 = vadd.f32 0.05243302, %v1370_v11 }
 0xc7e   :  { %v1383_v8 = vmul.f32 %v1382_v4, %v1365_v50  ;;  %v1408_v9 = vmul.f32 %v1407_v39, %v1405_v62  ;;  %v1419_v10 = vmul.f32 %v1418_v6, %v1405_v62  ;;  %v1361_v4 = vmul.f32 0.5, %v2245_v53 }
 0xc7f   :  { %v1372_v22 = vmul.f32 %v1371_v28, %v1365_v50 }
 0xc80   :  { %v1384_v38 = vadd.f32 0.4994258, %v1383_v8  ;;  %v1409_v12 = vadd.f32 0.0036580483, %v1408_v9  ;;  %v1420_v13 = vadd.f32 0.014752088, %v1419_v10 }
 0xc81   :  { %v1373_v31 = vadd.f32 0.18741608, %v1372_v22 }
 0xc82   :  { %v1385_v15 = vmul.f32 %v1384_v38, %v1365_v50  ;;  %v1421_v27 = vmul.f32 %v1420_v13, %v1405_v62  ;;  %v1410_v33 = vmul.f32 %v1409_v12, %v1405_v62 }
 0xc83   :  { %v1374_v14 = vmul.f32 %v1373_v31, %v1365_v50 }
 0xc84   :  { %v1386_v17 = vadd.f32 1.0, %v1385_v15  ;;  %v1422_v18 = vadd.f32 0.112945676, %v1421_v27  ;;  %v1411_v23 = vadd.f32 0.05243302, %v1410_v33 }
 0xc85   :  { %v1375_v41 = vadd.f32 1.1283791, %v1374_v14 }
 0xc86   :  { %1798 = vrcp.f32 %v1386_v17  ;;  %v1423_v21 = vmul.f32 %v1422_v18, %v1405_v62  ;;  %v1412_v34 = vmul.f32 %v1411_v23, %v1405_v62  ;;  %v1398_v5 = vand.u32 2147483648, %v1386_v17 }
 0xc87   :  { %v1396_v7 = vand.u32 2147483647, %v1386_v17  ;;  %vm1392_vm9 = vweird.f32 %v1386_v17  ;;  %v1376_v30 = vmul.f32 %v1375_v41, %v2241_v48 }
 0xc88   :  { %v1424_v24 = vadd.f32 0.4994258, %v1423_v21  ;;  %v1413_v37 = vadd.f32 0.18741608, %v1412_v34  ;;  %v1399_v43 = vor.u32 1.1754944e-38, %v1398_v5 }
 0xc89   :  { %vm1397_vm11 = vcmp.eq.f32.partialorder %v1396_v7, 8.507059e+37 }
 0xc8a   :  { %v1425_v25 = vmul.f32 %v1424_v24, %v1405_v62  ;;  %v1414_v44 = vmul.f32 %v1413_v37, %v1405_v62 }
 0xc8c   :  { %v1799_v26 = vpop.eup %1798  ;;  %v1426_v45 = vadd.f32 1.0, %v1425_v25  ;;  %v1415_v50 = vadd.f32 1.1283791, %v1414_v44 }
 0xc8d   :  { %v1388_v32 = vmul.f32 %v1799_v26, %v1386_v17  ;;  %vm1393_vm8 = vweird.f32 %v1799_v26 }
 0xc8e   :  { %1800 = vrcp.f32 %v1426_v45  ;;  %vm1394_vm10 = vmor %vm1392_vm9, %vm1393_vm8  ;;  %v1438_v49 = vand.u32 2147483648, %v1426_v45  ;;  %v1436_v55 = vand.u32 2147483647, %v1426_v45  ;;  %vm1432_vm13 = vweird.f32 %v1426_v45 }
 0xc8f   :  { %v1389_v35 = vsub.f32 1.0, %v1388_v32  ;;  %v1416_v61 = vmul.f32 %v1415_v50, %v2248_v56  ;;  %v1751_v56 = vld [vmem:[%s2289_s16] ss:$0 sm:$0xff]  ;;  %s1830_s16 = smov 128  }
 0xc90   :  { %v1439_v58 = vor.u32 1.1754944e-38, %v1438_v49  ;;  %vm1437_vm15 = vcmp.eq.f32.partialorder %v1436_v55, 8.507059e+37 }
 0xc91   :  { %v1390_v36 = vmul.f32 %v1799_v26, %v1389_v35 }
 0xc93   :  { %v1391_v40 = vadd.f32 %v1799_v26, %v1390_v36 }
 0xc94   :  { %v1801_v42 = vpop.eup %1800 }
 0xc95   :  { %v1395_v29 = vsel %vm1394_vm10, %v1799_v26, %v1391_v40  ;;  %v1428_v19 = vmul.f32 %v1801_v42, %v1426_v45  ;;  %vm1433_vm12 = vweird.f32 %v1801_v42 }
 0xc96   :  { %v1400_v46 = vsel %vm1397_vm11, %v1399_v43, %v1395_v29  ;;  %vm1434_vm14 = vmor %vm1432_vm13, %vm1433_vm12 }
 0xc97   :  { %v1429_v51 = vsub.f32 1.0, %v1428_v19  ;;  %v1401_v52 = vmul.f32 %v1400_v46, %v1376_v30 }
 0xc99   :  { %v1430_v54 = vmul.f32 %v1801_v42, %v1429_v51  ;;  %v1698_v59 = vclamps-f32 %v1401_v52, 1.0 }
 0xc9b   :  { %v1431_v57 = vadd.f32 %v1801_v42, %v1430_v54  ;;  %v1444_v2 = vadd.f32 1.0, %v1698_v59 }
 0xc9d   :  { %v1435_v62 = vsel %vm1434_vm14, %v1801_v42, %v1431_v57  ;;  %v1446_v6 = vmul.f32 %v1444_v2, %v1360_v3 }
 0xc9e   :  { %v1440_v63 = vsel %vm1437_vm15, %v1439_v58, %v1435_v62 }
 0xc9f   :  { %v1441_v0 = vmul.f32 %v1440_v63, %v1416_v61 }
 0xca1   :  { %v1699_v48 = vclamps-f32 %v1441_v0, 1.0 }
 0xca3   :  { %v1445_v39 = vadd.f32 1.0, %v1699_v48 }
 0xca5   :  { %v1447_v8 = vmul.f32 %v1445_v39, %v1361_v4 }
 0xca7   :  { %v1448_v9 = vpack.c.bf16 %v1447_v8, %v1446_v6 }
 0xca9   :  { %1708 = vmatmul.msk.bf16.vlgmr.msra.gmra.mxu2 %vm64_vm0, %v1448_v9 }
 0xd2c   :  { %v1481_v10 = vpop.f32.mrf.mxu2 }
 0xd2d   :  { %v1482_v11 = vadd.f32 %v1751_v56, %v1481_v10 }
 0xd2f   :  { %v1486_v38 = vadd.f32 %v1482_v11, %v2205_v60 }
 0xd31   :  { %1488 = vst.msk [vmem:[#allocation2] sm:$0xff] %vm64_vm0, %v1486_v38 }
 0xd34   :  { %v1483_v47 = vpop.f32.mrf.mxu2 }
 0xd35   :  { %v1484_v53 = vadd.f32 %v1751_v56, %v1483_v47 }
 0xd37   :  { %v1487_v12 = vadd.f32 %v1484_v53, %v2210_v1 }
 0xd39   :  { %1489 = vst.msk [vmem:[#allocation2 + $0x8] sm:$0xff] %vm64_vm0, %v1487_v12 }
 0xd3a   :  { %1502 = dma.vmem_to_hbm [thread:$0]  %s1495_s21, 256, %s1497_s24, [#allocation3], %s1830_s16, %s1830_s16, %s1831_s25  }
 0xd3b   :  { %1826 = dma.done.wait [#allocation3], 256  }
 0xd3c   :  { %1827 = vsyncadd [#allocation3], 4294967040 }
 0xd3d   :  { %1507 = vsyncpa [#allocation3], 1 }

</bundles_post_ra>
